<compile_context>
chip_gen: v5e
topology: v5e:2x2
jax: 0.10.0
libtpu: 0.0.40
codegen_flags: <defaults>
</compile_context>

<pallas_src>
import functools
import math

import jax
import jax.numpy as jnp
from jax.experimental import pallas as pl
from jax.experimental.pallas import tpu as pltpu


# ----------------------------------------------------------------------------
# Pallas kernel: one full CNNReduce block pair for a single branch
#   conv1(k=3,p=1) -> bn1 -> gelu -> conv2(k=3,p=1) -> bn2 -> gelu
# ----------------------------------------------------------------------------
def _cnnreduce_kernel(x_ref, valid_ref, w1_ref, g1_ref, be1_ref,
                      w2_ref, g2_ref, be2_ref, o_ref, stk1_ref, stk2_ref,
                      *, inv_count):
    """Shapes (per grid step / branch):
      x_ref    : (Cin_p, N)        channels-first input, N = B * G_pad lanes
      valid_ref: (1, N)            1.0 on valid (B, G) lanes, 0.0 on padding lanes
      wK_ref   : (Cout, 3*Cin_p)   flattened conv taps; cols [k*Cin_p, ...) hit x[l+k-1]
      gK / beK : (Cout, 1)         BatchNorm affine (gamma / beta)
      o_ref    : (Cout2, N)
      stkK_ref : (3*Cin_p, N) VMEM scratch holding the stacked shifted activations
    """
    valid = valid_ref[...]                      # (1, N), broadcasts over channels

    def conv_bn_gelu(h, stack_ref, w_ref, gamma, beta, zero_pad_lanes):
        c, n = h.shape
        # Conv1d(k=3, padding=1) as ONE matmul: stack [x(l-1); x(l); x(l+1)] along
        # the channel (sublane) axis in VMEM scratch.  Roll wraparound only lands
        # in padded lanes because each sequence has >= 1 zero padding lane.
        stack_ref[0:c, :] = pltpu.roll(h, 1, axis=1)          # x[l-1]
        stack_ref[c:2 * c, :] = h                             # x[l]
        stack_ref[2 * c:3 * c, :] = pltpu.roll(h, n - 1, axis=1)  # x[l+1]
        y = jnp.dot(w_ref[...], stack_ref[...],
                    preferred_element_type=jnp.float32)        # (Cout, N)
        # (conv bias omitted: cancels exactly against training-mode BN mean subtract)

        # BatchNorm1d, training-mode batch stats over valid (B, G) lanes only.
        # Single pass: var = E[y^2] - mean^2 (both reductions issue back-to-back).
        yv = y * valid
        mean = jnp.sum(yv, axis=1, keepdims=True) * inv_count
        ex2 = jnp.sum(yv * yv, axis=1, keepdims=True) * inv_count
        var = ex2 - mean * mean
        scale = gamma * jax.lax.rsqrt(var + 1e-5)
        shift = beta - mean * scale
        y_hat = y * scale + shift

        # Exact (erf) GELU, matching torch.nn.functional.gelu default.
        act = 0.5 * y_hat * (1.0 + jax.lax.erf(y_hat * 0.7071067811865476))
        if zero_pad_lanes:
            # Zero padded lanes so they behave like conv zero-padding for stage 2.
            act = act * valid
        return act

    h1 = conv_bn_gelu(x_ref[...], stk1_ref, w1_ref, g1_ref[...], be1_ref[...], True)
    # Last stage: padded output lanes are discarded on the host, no final masking.
    o_ref[...] = conv_bn_gelu(h1, stk2_ref, w2_ref, g2_ref[...], be2_ref[...], False)


# ----------------------------------------------------------------------------
# Model forward: both branches fused into one pallas_call (grid = branches).
# ----------------------------------------------------------------------------
def model_forward(x, params_time, params_freq, modulation):
    """Model.forward: x (B, seq_len, 2) -> (B, G, reduce_ch, 2)."""
    B, S, _ = x.shape
    desired = math.ceil(S / modulation) * modulation
    G = desired // modulation
    # TODO(synk): reference asserts (G, modulation) == (1366, 12) for the real DP64QAM
    # signal; skipped here so small synthetic shapes run.
    G_pad = ((G + 127) // 128) * 128
    if G_pad == G:
        G_pad += 128   # guarantee >=1 zero padding lane per sequence (roll safety)
    N = B * G_pad
    Cin = modulation
    Cin_p = ((Cin + 7) // 8) * 8
    Cout1 = params_time["w1"].shape[0]
    Cout2 = params_time["w2"].shape[0]

    # (B, S, 2) -> (2, Cin_p, B*G_pad): both branches at once, single transpose chain.
    xb = jnp.transpose(x, (2, 0, 1))                                 # (2, B, S)
    if desired > S:
        xb = jnp.pad(xb, ((0, 0), (0, 0), (0, desired - S)))
    xg = xb.reshape(2, B, G, Cin)
    xg = jnp.pad(xg, ((0, 0), (0, 0), (0, G_pad - G), (0, Cin_p - Cin)))
    x_all = jnp.transpose(xg, (0, 3, 1, 2)).reshape(2, Cin_p, N)     # (2, Cin_p, N)

    # Single valid-lane mask row shared by both branches.
    pos = jax.lax.broadcasted_iota(jnp.int32, (1, G_pad), 1)
    valid = jnp.tile((pos < G).astype(jnp.float32), (1, B))          # (1, N)

    def stack(name):
        return jnp.stack([params_time[name], params_freq[name]], axis=0)

    w1_all, g1_all, be1_all = stack("w1"), stack("g1"), stack("be1")
    w2_all, g2_all, be2_all = stack("w2"), stack("g2"), stack("be2")

    kernel = functools.partial(_cnnreduce_kernel, inv_count=1.0 / float(B * G))

    # Rough per-branch VMEM footprint (double-buffered in/out + scratches + temps);
    # explicit limit matters on v5e (16 MiB default scoped VMEM).
    est = 4 * N * (2 * (Cin_p + 1 + Cout2) + 3 * Cin_p + 3 * Cout1 + 4 * Cout1)
    vmem_limit = int(min(max(2 * est, 32 * 1024 * 1024), 100 * 1024 * 1024))

    out = pl.pallas_call(
        kernel,
        out_shape=jax.ShapeDtypeStruct((2, Cout2, N), jnp.float32),
        grid=(2,),  # one grid step per branch (time / freq)
        in_specs=[
            pl.BlockSpec((None, Cin_p, N), lambda br: (br, 0, 0)),
            pl.BlockSpec((1, N), lambda br: (0, 0)),
            pl.BlockSpec((None, Cout1, 3 * Cin_p), lambda br: (br, 0, 0)),
            pl.BlockSpec((None, Cout1, 1), lambda br: (br, 0, 0)),
            pl.BlockSpec((None, Cout1, 1), lambda br: (br, 0, 0)),
            pl.BlockSpec((None, Cout2, 3 * Cout1), lambda br: (br, 0, 0)),
            pl.BlockSpec((None, Cout2, 1), lambda br: (br, 0, 0)),
            pl.BlockSpec((None, Cout2, 1), lambda br: (br, 0, 0)),
        ],
        out_specs=pl.BlockSpec((None, Cout2, N), lambda br: (br, 0, 0)),
        scratch_shapes=[
            pltpu.VMEM((3 * Cin_p, N), jnp.float32),
            pltpu.VMEM((3 * Cout1, N), jnp.float32),
        ],
        compiler_params=pltpu.CompilerParams(
            dimension_semantics=("parallel",),   # v7x: one branch per TensorCore
            vmem_limit_bytes=vmem_limit),
    )(x_all, valid, w1_all, g1_all, be1_all, w2_all, g2_all, be2_all)

    # (2, Cout2, B*G_pad) -> (2, B, G, Cout2)
    out = jnp.transpose(out.reshape(2, Cout2, B, G_pad)[:, :, :, :G], (0, 2, 3, 1))
    # TODO(synk): transformer.Model is external and not provided -> identity; the
    # reference also calls an nn.ModuleList directly (not executable PyTorch), so
    # one CNNReduce per branch is used.
    time_output, freq_output = out[0], out[1]
    return jnp.concatenate(
        [time_output[..., None], freq_output[..., None]], axis=3)  # (B, G, C, 2)


# ----------------------------------------------------------------------------
# Parameter init (deterministic, mirrors nn.Conv1d / nn.BatchNorm1d shapes)
# ----------------------------------------------------------------------------
def init_cnnreduce_params(key, modulation, cnn_dim, reduce_ch):
    """Returns (kernel_params, raw_params).

    kernel_params: tap-flattened / channel-padded tensors consumed by the kernel.
    raw_params:    PyTorch-layout tensors used by the pure-JAX reference check.
    """
    k1, k2, k3, k4 = jax.random.split(key, 4)
    # PyTorch Conv1d weight layout: (C_out, C_in, K=3); bias (C_out,)
    w1 = jax.random.normal(k1, (cnn_dim, modulation, 3), jnp.float32) * 0.1
    b1 = jax.random.normal(k2, (cnn_dim,), jnp.float32) * 0.01
    w2 = jax.random.normal(k3, (reduce_ch, cnn_dim, 3), jnp.float32) * 0.1
    b2 = jax.random.normal(k4, (reduce_ch,), jnp.float32) * 0.01
    # BatchNorm1d defaults: gamma = 1, beta = 0.
    g1, be1 = jnp.ones((cnn_dim,), jnp.float32), jnp.zeros((cnn_dim,), jnp.float32)
    g2, be2 = jnp.ones((reduce_ch,), jnp.float32), jnp.zeros((reduce_ch,), jnp.float32)

    cin_p = ((modulation + 7) // 8) * 8

    def flatten_taps(w, cin, cin_pad):
        # (Cout, Cin, 3) -> (Cout, 3*Cin_pad); tap k (hits x[l+k-1]) occupies
        # columns [k*Cin_pad, k*Cin_pad + Cin), matching the kernel's stack order
        # [x(l-1); x(l); x(l+1)].
        taps = [jnp.pad(w[:, :, k], ((0, 0), (0, cin_pad - cin))) for k in range(3)]
        return jnp.concatenate(taps, axis=1)

    # Conv biases are NOT passed to the kernel: with training-mode BN they cancel
    # exactly against the mean subtraction.
    kernel_params = dict(
        w1=flatten_taps(w1, modulation, cin_p),
        g1=g1.reshape(-1, 1), be1=be1.reshape(-1, 1),
        w2=flatten_taps(w2, cnn_dim, cnn_dim),
        g2=g2.reshape(-1, 1), be2=be2.reshape(-1, 1),
    )
    raw_params = dict(w1=w1, b1=b1, g1=g1, be1=be1, w2=w2, b2=b2, g2=g2, be2=be2)
    return kernel_params, raw_params


# ----------------------------------------------------------------------------
# Pure-JAX (XLA) reference of the same forward, for correctness checking.
# ----------------------------------------------------------------------------
def _reference_cnnreduce(x, raw, modulation):
    B, S = x.shape
    desired = math.ceil(S / modulation) * modulation
    if desired > S:
        x = jnp.pad(x, ((0, 0), (0, desired - S)))
    G = desired // modulation
    h = jnp.transpose(x.reshape(B, G, modulation), (0, 2, 1))   # NCL

    def block(h, w, b, gamma, beta):
        y = jax.lax.conv_general_dilated(
            h, w, window_strides=(1,), padding=[(1, 1)],
            dimension_numbers=("NCH", "OIH", "NCH"))
        y = y + b[None, :, None]
        mean = jnp.mean(y, axis=(0, 2), keepdims=True)
        var = jnp.mean((y - mean) ** 2, axis=(0, 2), keepdims=True)
        y = (y - mean) * jax.lax.rsqrt(var + 1e-5)
        y = y * gamma[None, :, None] + beta[None, :, None]
        return 0.5 * y * (1.0 + jax.lax.erf(y * 0.7071067811865476))

    h = block(h, raw["w1"], raw["b1"], raw["g1"], raw["be1"])
    h = block(h, raw["w2"], raw["b2"], raw["g2"], raw["be2"])
    return jnp.transpose(h, (0, 2, 1))


def _reference_model(x, raw_time, raw_freq, modulation):
    t = _reference_cnnreduce(x[:, :, 0], raw_time, modulation)
    f = _reference_cnnreduce(x[:, :, 1], raw_freq, modulation)
    return jnp.concatenate([t[..., None], f[..., None]], axis=3)


if __name__ == "__main__":
    # Small synthetic config consistent with the module's structure.
    batch = 2
    seq_len = 100
    modulation = 12     # args.modulation  -> conv1 in_channels
    cnn_dim = 32        # args.CNN_dim
    reduce_ch = 8       # args.reduce_ch

    key = jax.random.PRNGKey(0)
    kx, kt, kf = jax.random.split(key, 3)
    x = jax.random.normal(kx, (batch, seq_len, 2), jnp.float32)

    kp_time, raw_time = init_cnnreduce_params(kt, modulation, cnn_dim, reduce_ch)
    kp_freq, raw_freq = init_cnnreduce_params(kf, modulation, cnn_dim, reduce_ch)

    fwd = jax.jit(lambda inp: model_forward(inp, kp_time, kp_freq, modulation))
    out = jax.block_until_ready(fwd(x))

    expected_G = math.ceil(seq_len / modulation)
    assert out.shape == (batch, expected_G, reduce_ch, 2), out.shape
    assert bool(jnp.all(jnp.isfinite(out)))

    # Numerical check against the pure-JAX reference (training-mode BN, erf GELU).
    ref = _reference_model(x, raw_time, raw_freq, modulation)
    max_err = float(jnp.max(jnp.abs(out - ref)))
    assert max_err < 1e-3, f"max abs err vs reference: {max_err}"
    print("KERNEL_OK")
</pallas_src>

<mosaic_0001>
module attributes {stable_mosaic.version = 11 : i64} {
  func.func @_cnnreduce_kernel(%arg0: i32, %arg1: memref<1x16x256xf32, #tpu.memory_space<vmem>>, %arg2: memref<1x256xf32, #tpu.memory_space<vmem>>, %arg3: memref<1x32x48xf32, #tpu.memory_space<vmem>>, %arg4: memref<1x32x1xf32, #tpu.memory_space<vmem>>, %arg5: memref<1x32x1xf32, #tpu.memory_space<vmem>>, %arg6: memref<1x8x96xf32, #tpu.memory_space<vmem>>, %arg7: memref<1x8x1xf32, #tpu.memory_space<vmem>>, %arg8: memref<1x8x1xf32, #tpu.memory_space<vmem>>, %arg9: memref<1x8x256xf32, #tpu.memory_space<vmem>>, %arg10: memref<48x256xf32, #tpu.memory_space<vmem>>, %arg11: memref<96x256xf32, #tpu.memory_space<vmem>>) attributes {dimension_semantics = [#tpu.dimension_semantics<parallel>], iteration_bounds = array<i64: 2>, scalar_prefetch = 0 : i64, scratch_operands = 2 : i64, tpu.core_type = #tpu.core_type<tc>, window_params = [{transform_indices = @transform_0, window_bounds = array<i64: 1, 16, 256>}, {pipeline_mode = #tpu.pipeline_mode<synchronous>, transform_indices = @transform_1, window_bounds = array<i64: 1, 256>}, {transform_indices = @transform_2, window_bounds = array<i64: 1, 32, 48>}, {transform_indices = @transform_3, window_bounds = array<i64: 1, 32, 1>}, {transform_indices = @transform_4, window_bounds = array<i64: 1, 32, 1>}, {transform_indices = @transform_5, window_bounds = array<i64: 1, 8, 96>}, {transform_indices = @transform_6, window_bounds = array<i64: 1, 8, 1>}, {transform_indices = @transform_7, window_bounds = array<i64: 1, 8, 1>}, {transform_indices = @transform_8, window_bounds = array<i64: 1, 8, 256>}]} {
    %c0 = arith.constant 0 : index
    %c0_0 = arith.constant 0 : index
    %0 = vector.load %arg2[%c0, %c0_0] : memref<1x256xf32, #tpu.memory_space<vmem>>, vector<1x256xf32>
    %c0_1 = arith.constant 0 : index
    %c0_2 = arith.constant 0 : index
    %c0_3 = arith.constant 0 : index
    %1 = vector.load %arg1[%c0_1, %c0_2, %c0_3] : memref<1x16x256xf32, #tpu.memory_space<vmem>>, vector<1x16x256xf32>
    %2 = vector.shape_cast %1 : vector<1x16x256xf32> to vector<16x256xf32>
    %c0_4 = arith.constant 0 : index
    %c0_5 = arith.constant 0 : index
    %c0_6 = arith.constant 0 : index
    %3 = vector.load %arg4[%c0_4, %c0_5, %c0_6] : memref<1x32x1xf32, #tpu.memory_space<vmem>>, vector<1x32x1xf32>
    %4 = vector.shape_cast %3 : vector<1x32x1xf32> to vector<32x1xf32>
    %c0_7 = arith.constant 0 : index
    %c0_8 = arith.constant 0 : index
    %c0_9 = arith.constant 0 : index
    %5 = vector.load %arg5[%c0_7, %c0_8, %c0_9] : memref<1x32x1xf32, #tpu.memory_space<vmem>>, vector<1x32x1xf32>
    %6 = vector.shape_cast %5 : vector<1x32x1xf32> to vector<32x1xf32>
    %c1_i32 = arith.constant 1 : i32
    %7 = tpu.dynamic_rotate %2 by %c1_i32 dim 1 : vector<16x256xf32>, i32 -> vector<16x256xf32>
    %c0_10 = arith.constant 0 : index
    %c0_11 = arith.constant 0 : index
    %8 = vector.load %arg10[%c0_10, %c0_11] : memref<48x256xf32, #tpu.memory_space<vmem>>, vector<16x256xf32>
    tpu.vector_store %arg10[%c0_10, %c0_11], %7 {strides = array<i32>} : memref<48x256xf32, #tpu.memory_space<vmem>>, vector<16x256xf32>,
    %c16 = arith.constant 16 : index
    %c0_12 = arith.constant 0 : index
    %9 = vector.load %arg10[%c16, %c0_12] : memref<48x256xf32, #tpu.memory_space<vmem>>, vector<16x256xf32>
    tpu.vector_store %arg10[%c16, %c0_12], %2 {strides = array<i32>} : memref<48x256xf32, #tpu.memory_space<vmem>>, vector<16x256xf32>,
    %c255_i32 = arith.constant 255 : i32
    %10 = tpu.dynamic_rotate %2 by %c255_i32 dim 1 : vector<16x256xf32>, i32 -> vector<16x256xf32>
    %c32 = arith.constant 32 : index
    %c0_13 = arith.constant 0 : index
    %11 = vector.load %arg10[%c32, %c0_13] : memref<48x256xf32, #tpu.memory_space<vmem>>, vector<16x256xf32>
    tpu.vector_store %arg10[%c32, %c0_13], %10 {strides = array<i32>} : memref<48x256xf32, #tpu.memory_space<vmem>>, vector<16x256xf32>,
    %c0_14 = arith.constant 0 : index
    %c0_15 = arith.constant 0 : index
    %c0_16 = arith.constant 0 : index
    %12 = vector.load %arg3[%c0_14, %c0_15, %c0_16] : memref<1x32x48xf32, #tpu.memory_space<vmem>>, vector<1x32x48xf32>
    %13 = vector.shape_cast %12 : vector<1x32x48xf32> to vector<32x48xf32>
    %c0_17 = arith.constant 0 : index
    %c0_18 = arith.constant 0 : index
    %14 = vector.load %arg10[%c0_17, %c0_18] : memref<48x256xf32, #tpu.memory_space<vmem>>, vector<48x256xf32>
    %cst = arith.constant dense<0.000000e+00> : vector<32x256xf32>
    %15 = tpu.matmul %13, %14, %cst {dimension_numbers = #tpu.dot_dimension_numbers<[1], [0], [0], [1], [0, 0, 1, 1], [], []>} : vector<32x48xf32>, vector<48x256xf32>, vector<32x256xf32> -> vector<32x256xf32>
    %16 = vector.broadcast %0 : vector<1x256xf32> to vector<32x256xf32>
    %17 = arith.mulf %15, %16 : vector<32x256xf32>
    %cst_19 = arith.constant dense<0.000000e+00> : vector<32xf32>
    %18 = vector.multi_reduction <add>, %17, %cst_19 [1] : vector<32x256xf32> to vector<32xf32>
    %19 = vector.shape_cast %18 : vector<32xf32> to vector<32x1xf32>
    %cst_20 = arith.constant 0.055555556 : f32
    %20 = vector.broadcast %cst_20 : f32 to vector<32x1xf32>
    %21 = arith.mulf %19, %20 : vector<32x1xf32>
    %22 = arith.mulf %17, %17 : vector<32x256xf32>
    %cst_21 = arith.constant dense<0.000000e+00> : vector<32xf32>
    %23 = vector.multi_reduction <add>, %22, %cst_21 [1] : vector<32x256xf32> to vector<32xf32>
    %24 = vector.shape_cast %23 : vector<32xf32> to vector<32x1xf32>
    %cst_22 = arith.constant 0.055555556 : f32
    %25 = vector.broadcast %cst_22 : f32 to vector<32x1xf32>
    %26 = arith.mulf %24, %25 : vector<32x1xf32>
    %27 = arith.mulf %21, %21 : vector<32x1xf32>
    %28 = arith.subf %26, %27 : vector<32x1xf32>
    %cst_23 = arith.constant 9.99999974E-6 : f32
    %29 = vector.broadcast %cst_23 : f32 to vector<32x1xf32>
    %30 = arith.addf %28, %29 : vector<32x1xf32>
    %31 = math.rsqrt %30 : vector<32x1xf32>
    %32 = arith.mulf %4, %31 : vector<32x1xf32>
    %33 = arith.mulf %21, %32 : vector<32x1xf32>
    %34 = arith.subf %6, %33 : vector<32x1xf32>
    %35 = vector.broadcast %32 : vector<32x1xf32> to vector<32x256xf32>
    %36 = arith.mulf %15, %35 : vector<32x256xf32>
    %37 = vector.broadcast %34 : vector<32x1xf32> to vector<32x256xf32>
    %38 = arith.addf %36, %37 : vector<32x256xf32>
    %cst_24 = arith.constant 5.000000e-01 : f32
    %39 = vector.broadcast %cst_24 : f32 to vector<32x256xf32>
    %40 = arith.mulf %39, %38 : vector<32x256xf32>
    %cst_25 = arith.constant 0.707106769 : f32
    %41 = vector.broadcast %cst_25 : f32 to vector<32x256xf32>
    %42 = arith.mulf %38, %41 : vector<32x256xf32>
    %43 = math.erf %42 : vector<32x256xf32>
    %cst_26 = arith.constant 1.000000e+00 : f32
    %44 = vector.broadcast %cst_26 : f32 to vector<32x256xf32>
    %45 = arith.addf %44, %43 : vector<32x256xf32>
    %46 = arith.mulf %40, %45 : vector<32x256xf32>
    %47 = vector.broadcast %0 : vector<1x256xf32> to vector<32x256xf32>
    %48 = arith.mulf %46, %47 : vector<32x256xf32>
    %c0_27 = arith.constant 0 : index
    %c0_28 = arith.constant 0 : index
    %c0_29 = arith.constant 0 : index
    %49 = vector.load %arg7[%c0_27, %c0_28, %c0_29] : memref<1x8x1xf32, #tpu.memory_space<vmem>>, vector<1x8x1xf32>
    %50 = vector.shape_cast %49 : vector<1x8x1xf32> to vector<8x1xf32>
    %c0_30 = arith.constant 0 : index
    %c0_31 = arith.constant 0 : index
    %c0_32 = arith.constant 0 : index
    %51 = vector.load %arg8[%c0_30, %c0_31, %c0_32] : memref<1x8x1xf32, #tpu.memory_space<vmem>>, vector<1x8x1xf32>
    %52 = vector.shape_cast %51 : vector<1x8x1xf32> to vector<8x1xf32>
    %c1_i32_33 = arith.constant 1 : i32
    %53 = tpu.dynamic_rotate %48 by %c1_i32_33 dim 1 : vector<32x256xf32>, i32 -> vector<32x256xf32>
    %c0_34 = arith.constant 0 : index
    %c0_35 = arith.constant 0 : index
    %54 = vector.load %arg11[%c0_34, %c0_35] : memref<96x256xf32, #tpu.memory_space<vmem>>, vector<32x256xf32>
    tpu.vector_store %arg11[%c0_34, %c0_35], %53 {strides = array<i32>} : memref<96x256xf32, #tpu.memory_space<vmem>>, vector<32x256xf32>,
    %c32_36 = arith.constant 32 : index
    %c0_37 = arith.constant 0 : index
    %55 = vector.load %arg11[%c32_36, %c0_37] : memref<96x256xf32, #tpu.memory_space<vmem>>, vector<32x256xf32>
    tpu.vector_store %arg11[%c32_36, %c0_37], %48 {strides = array<i32>} : memref<96x256xf32, #tpu.memory_space<vmem>>, vector<32x256xf32>,
    %c255_i32_38 = arith.constant 255 : i32
    %56 = tpu.dynamic_rotate %48 by %c255_i32_38 dim 1 : vector<32x256xf32>, i32 -> vector<32x256xf32>
    %c64 = arith.constant 64 : index
    %c0_39 = arith.constant 0 : index
    %57 = vector.load %arg11[%c64, %c0_39] : memref<96x256xf32, #tpu.memory_space<vmem>>, vector<32x256xf32>
    tpu.vector_store %arg11[%c64, %c0_39], %56 {strides = array<i32>} : memref<96x256xf32, #tpu.memory_space<vmem>>, vector<32x256xf32>,
    %c0_40 = arith.constant 0 : index
    %c0_41 = arith.constant 0 : index
    %c0_42 = arith.constant 0 : index
    %58 = vector.load %arg6[%c0_40, %c0_41, %c0_42] : memref<1x8x96xf32, #tpu.memory_space<vmem>>, vector<1x8x96xf32>
    %59 = vector.shape_cast %58 : vector<1x8x96xf32> to vector<8x96xf32>
    %c0_43 = arith.constant 0 : index
    %c0_44 = arith.constant 0 : index
    %60 = vector.load %arg11[%c0_43, %c0_44] : memref<96x256xf32, #tpu.memory_space<vmem>>, vector<96x256xf32>
    %cst_45 = arith.constant dense<0.000000e+00> : vector<8x256xf32>
    %61 = tpu.matmul %59, %60, %cst_45 {dimension_numbers = #tpu.dot_dimension_numbers<[1], [0], [0], [1], [0, 0, 1, 1], [], []>} : vector<8x96xf32>, vector<96x256xf32>, vector<8x256xf32> -> vector<8x256xf32>
    %62 = vector.broadcast %0 : vector<1x256xf32> to vector<8x256xf32>
    %63 = arith.mulf %61, %62 : vector<8x256xf32>
    %cst_46 = arith.constant dense<0.000000e+00> : vector<8xf32>
    %64 = vector.multi_reduction <add>, %63, %cst_46 [1] : vector<8x256xf32> to vector<8xf32>
    %65 = vector.shape_cast %64 : vector<8xf32> to vector<8x1xf32>
    %cst_47 = arith.constant 0.055555556 : f32
    %66 = vector.broadcast %cst_47 : f32 to vector<8x1xf32>
    %67 = arith.mulf %65, %66 : vector<8x1xf32>
    %68 = arith.mulf %63, %63 : vector<8x256xf32>
    %cst_48 = arith.constant dense<0.000000e+00> : vector<8xf32>
    %69 = vector.multi_reduction <add>, %68, %cst_48 [1] : vector<8x256xf32> to vector<8xf32>
    %70 = vector.shape_cast %69 : vector<8xf32> to vector<8x1xf32>
    %cst_49 = arith.constant 0.055555556 : f32
    %71 = vector.broadcast %cst_49 : f32 to vector<8x1xf32>
    %72 = arith.mulf %70, %71 : vector<8x1xf32>
    %73 = arith.mulf %67, %67 : vector<8x1xf32>
    %74 = arith.subf %72, %73 : vector<8x1xf32>
    %cst_50 = arith.constant 9.99999974E-6 : f32
    %75 = vector.broadcast %cst_50 : f32 to vector<8x1xf32>
    %76 = arith.addf %74, %75 : vector<8x1xf32>
    %77 = math.rsqrt %76 : vector<8x1xf32>
    %78 = arith.mulf %50, %77 : vector<8x1xf32>
    %79 = arith.mulf %67, %78 : vector<8x1xf32>
    %80 = arith.subf %52, %79 : vector<8x1xf32>
    %81 = vector.broadcast %78 : vector<8x1xf32> to vector<8x256xf32>
    %82 = arith.mulf %61, %81 : vector<8x256xf32>
    %83 = vector.broadcast %80 : vector<8x1xf32> to vector<8x256xf32>
    %84 = arith.addf %82, %83 : vector<8x256xf32>
    %cst_51 = arith.constant 5.000000e-01 : f32
    %85 = vector.broadcast %cst_51 : f32 to vector<8x256xf32>
    %86 = arith.mulf %85, %84 : vector<8x256xf32>
    %cst_52 = arith.constant 0.707106769 : f32
    %87 = vector.broadcast %cst_52 : f32 to vector<8x256xf32>
    %88 = arith.mulf %84, %87 : vector<8x256xf32>
    %89 = math.erf %88 : vector<8x256xf32>
    %cst_53 = arith.constant 1.000000e+00 : f32
    %90 = vector.broadcast %cst_53 : f32 to vector<8x256xf32>
    %91 = arith.addf %90, %89 : vector<8x256xf32>
    %92 = arith.mulf %86, %91 : vector<8x256xf32>
    %c0_54 = arith.constant 0 : index
    %c0_55 = arith.constant 0 : index
    %c0_56 = arith.constant 0 : index
    %93 = vector.load %arg9[%c0_54, %c0_55, %c0_56] : memref<1x8x256xf32, #tpu.memory_space<vmem>>, vector<1x8x256xf32>
    %94 = vector.shape_cast %93 : vector<1x8x256xf32> to vector<8x256xf32>
    %95 = vector.shape_cast %92 : vector<8x256xf32> to vector<1x8x256xf32>
    tpu.vector_store %arg9[%c0_54, %c0_55, %c0_56], %95 {strides = array<i32>} : memref<1x8x256xf32, #tpu.memory_space<vmem>>, vector<1x8x256xf32>,
    return
  }
  func.func @transform_0(%arg0: i32) -> (i32, i32, i32) {
    %c0_i32 = arith.constant 0 : i32
    %c0_i32_0 = arith.constant 0 : i32
    %c0_i32_1 = arith.constant 0 : i32
    return %arg0, %c0_i32, %c0_i32_0 : i32, i32, i32
  }
  func.func @transform_1(%arg0: i32) -> (i32, i32) {
    %c0_i32 = arith.constant 0 : i32
    %c0_i32_0 = arith.constant 0 : i32
    %c0_i32_1 = arith.constant 0 : i32
    return %c0_i32, %c0_i32_0 : i32, i32
  }
  func.func @transform_2(%arg0: i32) -> (i32, i32, i32) {
    %c0_i32 = arith.constant 0 : i32
    %c0_i32_0 = arith.constant 0 : i32
    %c0_i32_1 = arith.constant 0 : i32
    return %arg0, %c0_i32, %c0_i32_0 : i32, i32, i32
  }
  func.func @transform_3(%arg0: i32) -> (i32, i32, i32) {
    %c0_i32 = arith.constant 0 : i32
    %c0_i32_0 = arith.constant 0 : i32
    %c0_i32_1 = arith.constant 0 : i32
    return %arg0, %c0_i32, %c0_i32_0 : i32, i32, i32
  }
  func.func @transform_4(%arg0: i32) -> (i32, i32, i32) {
    %c0_i32 = arith.constant 0 : i32
    %c0_i32_0 = arith.constant 0 : i32
    %c0_i32_1 = arith.constant 0 : i32
    return %arg0, %c0_i32, %c0_i32_0 : i32, i32, i32
  }
  func.func @transform_5(%arg0: i32) -> (i32, i32, i32) {
    %c0_i32 = arith.constant 0 : i32
    %c0_i32_0 = arith.constant 0 : i32
    %c0_i32_1 = arith.constant 0 : i32
    return %arg0, %c0_i32, %c0_i32_0 : i32, i32, i32
  }
  func.func @transform_6(%arg0: i32) -> (i32, i32, i32) {
    %c0_i32 = arith.constant 0 : i32
    %c0_i32_0 = arith.constant 0 : i32
    %c0_i32_1 = arith.constant 0 : i32
    return %arg0, %c0_i32, %c0_i32_0 : i32, i32, i32
  }
  func.func @transform_7(%arg0: i32) -> (i32, i32, i32) {
    %c0_i32 = arith.constant 0 : i32
    %c0_i32_0 = arith.constant 0 : i32
    %c0_i32_1 = arith.constant 0 : i32
    return %arg0, %c0_i32, %c0_i32_0 : i32, i32, i32
  }
  func.func @transform_8(%arg0: i32) -> (i32, i32, i32) {
    %c0_i32 = arith.constant 0 : i32
    %c0_i32_0 = arith.constant 0 : i32
    %c0_i32_1 = arith.constant 0 : i32
    return %arg0, %c0_i32, %c0_i32_0 : i32, i32, i32
  }
}

</mosaic_0001>

<bundles_post_ra>
// kernel: _lambda_.1
= control target key start
LH: loop header
LB: loop body
LE: loop exit
PB: predicated region body
PF: predicated region fallthrough
CT: control target
= control target key end

     0   :  { %s1697_s27 = smov 0   ;;  %s2156_s0 = inlined_call_operand.vmem [shape: f32[2,16,256], index: 0, kind: input, shape index: {}]   ;;  %s2157_s1 = inlined_call_operand.vmem [shape: f32[1,256], index: 1, kind: input, shape index: {}]   ;;  %s2158_s2 = inlined_call_operand.vmem [shape: f32[2,32,48], index: 2, kind: input, shape index: {}]   ;;  %s2159_s3 = inlined_call_operand.vmem [shape: f32[2,32,1], index: 3, kind: input, shape index: {}]   ;;  %s2160_s4 = inlined_call_operand.vmem [shape: f32[2,32,1], index: 4, kind: input, shape index: {}]   ;;  %s2161_s5 = inlined_call_operand.vmem [shape: f32[2,8,96], index: 5, kind: input, shape index: {}]   ;;  %s2162_s6 = inlined_call_operand.vmem [shape: f32[2,8,1], index: 6, kind: input, shape index: {}]   ;;  %s2163_s7 = inlined_call_operand.vmem [shape: f32[2,8,1], index: 7, kind: input, shape index: {}]   ;;  %s2164_s8 = inlined_call_operand.vmem [shape: f32[2,8,256], index: 8, kind: output, shape index: {}]  }
   0x1 LB: > { %s1492_s28 = sadd.s32 4294967295, %s1647_s27   ;;  %p1496_p0 = scmp.ge.s32.totalorder %s1647_s27, 1  ;;  %s1647_s27 = sphi %s1697_s27, %s18_s27  }
   0x2   : > { %p319_p1 = scmp.lt.s32.totalorder %s1647_s27, 3 }
   0x4   : > { %p320_p2 = pnand %p1496_p0, %p319_p1 }
   0x5   : > { %p380_p3 = scmp.lt.s32.totalorder (!%p320_p2), %s1492_s28, 1  ;;  %s1649_s11 = smov (!%p320_p2), 127  }
   0x6   : > { %323 = sbr.rel (%p320_p2) target bundleno = 1272 (0x4f8), region = 52  ;;  %s1650_s12 = smov (!%p320_p2), 1  }
   0xb   : > { %s2174_s28 = smov (!%p380_p3, %s1492_s28), 1  ;;  %v438_v6 = vlaneseq  ;;  %vm486_vm2 = vcmask 392192   ;;  %v417_v34 = vld [vmem:[%s2157_s1] sm:$0x3] }
   0xc   : > { %s1708_s29 = sshll.u32 %s2174_s28, 5  ;;  %v1749_v35 = vperm.slane %v417_v34, 0  ;;  %v1751_v36 = vperm.slane %v417_v34, 1  ;;  %s2111_s24 = sshll.u32 %s2174_s28, 3 }
   0xd   : > { %s384_s10 = scalar_lea.vmem %s2156_s0, %s1708_s29  ;;  %v1718_v7 = vand.u32 127, %v438_v6  ;;  %s389_s15 = scalar_lea.vmem %s2158_s2, %s1708_s29 }
   0xe   : > { %v420_v0 = vld [vmem:[%s384_s10 + $0x10] sm:$0xff]  ;;  %v421_v1 = vld [vmem:[%s384_s10 + $0x18] sm:$0xff]  ;;  %v418_v3 = vld [vmem:[%s384_s10] sm:$0xff]  ;;  %s1799_s20 = scalar_lea.vmem %s2159_s3, %s1708_s29  ;;  %s399_s23 = scalar_lea.vmem %s2160_s4, %s1708_s29 }
   0xf   : > { %v1548_v2 = vpack.i.bf16 %v421_v1, %v420_v0  ;;  %v419_v4 = vld [vmem:[%s384_s10 + $0x8] sm:$0xff]  ;;  %vm461_vm0 = vcmp.lt.s32.totalorder %v1718_v7, 127  ;;  %vm440_vm1 = vcmp.lt.s32.totalorder %v1718_v7, 1  ;;  %v470_v28 = vld [vmem:[%s389_s15] sm:$0xff]  ;;  %v472_v30 = vld [vmem:[%s389_s15 + $0x10] sm:$0xff]  ;;  %s403_s29 = scalar_lea.vmem %s2161_s5, %s2111_s24  ;;  %s407_s10 = scalar_lea.vmem %s2162_s6, %s2111_s24 }
  0x10   : > { %v1553_v5 = vpack.i.bf16 %v419_v4, %v418_v3  ;;  %v471_v29 = vld [vmem:[%s389_s15 + $0x8] sm:$0xff]  ;;  %v473_v31 = vld [vmem:[%s389_s15 + $0x18] sm:$0xff]  ;;  %s411_s13 = scalar_lea.vmem %s2163_s7, %s2111_s24  ;;  %s1536_s14 = sshll.u32 %s2174_s28, 4 }
  0x11   : > { %1549 = vrot.lane.b32.xlu0 %v1548_v2, %s1649_s11  ;;  %1559 = vrot.lane.b32.xlu1 %v1548_v2, %s1650_s12  ;;  %s416_s17 = scalar_lea.vmem %s2164_s8, %s1536_s14 }
  0x19   : > { %1554 = vrot.lane.b32.xlu0 %v1553_v5, %s1649_s11  ;;  %1564 = vrot.lane.b32.xlu1 %v1553_v5, %s1650_s12  ;;  %v1651_v5 = vmov 0  }
  0x1a   : > { %1568 = vset.pattern.permute.xlu0 %v1651_v5  ;;  %1569 = vset.pattern.permute.xlu2 %v1651_v5 }
  0x1b   : > { %1570 = vset.pattern.permute.xlu1 %v1651_v5 }
  0x83   : > { %v1550_v8 = vpop.permute.xlu0 %1549  ;;  %v1560_v9 = vpop.permute.xlu1 %1559 }
  0x84   : > { %v1552_v10 = vunpack.i.h.bf16 %v1550_v8  ;;  %v1551_v11 = vunpack.i.l.bf16 %v1550_v8  ;;  %v1562_v20 = vunpack.i.h.bf16 %v1560_v9  ;;  %v1561_v21 = vunpack.i.l.bf16 %v1560_v9 }
  0x86   : > { %v463_v12 = vsel %vm461_vm0, %v1551_v11, %v1552_v10  ;;  %v465_v13 = vsel %vm461_vm0, %v1552_v10, %v1551_v11  ;;  %v444_v24 = vsel %vm440_vm1, %v1562_v20, %v1561_v21  ;;  %v442_v25 = vsel %vm440_vm1, %v1561_v21, %v1562_v20 }
  0x87   : > { %509 = vmatpush.msra.mxu0 %v463_v12  ;;  %538 = vmatpush.msra.mxu1 %v465_v13 }
  0x8b   : > { %v1555_v14 = vpop.permute.xlu0 %1554  ;;  %v1565_v17 = vpop.permute.xlu1 %1564 }
  0x8c   : > { %v1557_v15 = vunpack.i.h.bf16 %v1555_v14  ;;  %v1556_v16 = vunpack.i.l.bf16 %v1555_v14  ;;  %v1567_v22 = vunpack.i.h.bf16 %v1565_v17  ;;  %v1566_v23 = vunpack.i.l.bf16 %v1565_v17 }
  0x8e   : > { %v462_v18 = vsel %vm461_vm0, %v1556_v16, %v1557_v15  ;;  %v464_v19 = vsel %vm461_vm0, %v1557_v15, %v1556_v16  ;;  %v443_v26 = vsel %vm440_vm1, %v1567_v22, %v1566_v23  ;;  %v441_v27 = vsel %vm440_vm1, %v1566_v23, %v1567_v22 }
  0x8f   : > { %510 = vmatpush.msra.mxu0 %v462_v18  ;;  %539 = vmatpush.msra.mxu1 %v464_v19 }
  0x91   : > { %511 = vmatpush.msra.mxu0 %v420_v0  ;;  %540 = vmatpush.msra.mxu1 %v421_v1 }
  0x93   : > { %512 = vmatpush.msra.mxu0 %v418_v3  ;;  %541 = vmatpush.msra.mxu1 %v419_v4 }
  0x95   : > { %513 = vmatpush.msra.mxu0 %v444_v24  ;;  %542 = vmatpush.msra.mxu1 %v442_v25 }
  0x97   : > { %514 = vmatpush.msra.mxu0 %v443_v26  ;;  %543 = vmatpush.msra.mxu1 %v441_v27 }
  0x98   : > { %1510 = vmatmul.msk.f32.vlgmr.msra.gmra.mxu0 %vm486_vm2, %v470_v28  ;;  %1514 = vmatmul.msk.f32.vlgmr.msra.gmra.mxu1 %vm486_vm2, %v470_v28 }
  0xa0   : > { %1511 = vmatmul.msk.f32.gmra.mxu0 %vm486_vm2, %v471_v29  ;;  %1515 = vmatmul.msk.f32.gmra.mxu1 %vm486_vm2, %v471_v29 }
  0xa8   : > { %1512 = vmatmul.msk.f32.gmra.mxu0 %vm486_vm2, %v472_v30  ;;  %1516 = vmatmul.msk.f32.gmra.mxu1 %vm486_vm2, %v472_v30 }
  0xb0   : > { %1513 = vmatmul.msk.f32.gmra.mxu0 %vm486_vm2, %v473_v31  ;;  %1517 = vmatmul.msk.f32.gmra.mxu1 %vm486_vm2, %v473_v31 }
 0x115   : > { %v1742_v32 = vpop.f32.mrf.mxu0  ;;  %v1744_v33 = vpop.f32.mrf.mxu1 }
 0x116   : > { %v562_v58 = vmul.f32 %v1749_v35, %v1742_v32  ;;  %v563_v59 = vmul.f32 %v1751_v36, %v1744_v33 }
 0x118   : > { %v570_v60 = vadd.f32 %v563_v59, %v562_v58  ;;  %v586_v0 = vmul.f32 %v562_v58, %v562_v58  ;;  %v587_v1 = vmul.f32 %v563_v59, %v563_v59 }
 0x11a   : > { %v594_v2 = vadd.f32 %v587_v1, %v586_v0  ;;  %v423_v0 = vld [vmem:[%s1799_s20 + $0x8] sm:$0xff] }
 0x11d   : > { %v1753_v37 = vpop.f32.mrf.mxu0  ;;  %v1755_v38 = vpop.f32.mrf.mxu1 }
 0x11e   : > { %v564_v39 = vmul.f32 %v1749_v35, %v1753_v37  ;;  %v565_v40 = vmul.f32 %v1751_v36, %v1755_v38 }
 0x120   : > { %v573_v41 = vadd.f32 %v565_v40, %v564_v39  ;;  %v588_v61 = vmul.f32 %v564_v39, %v564_v39  ;;  %v589_v62 = vmul.f32 %v565_v40, %v565_v40  ;;  %v424_v39 = vld [vmem:[%s1799_s20 + $0x10] sm:$0xff] }
 0x122   : > { %574 = vadd.xlane.f32.xlu1 %v573_v41  ;;  %v597_v63 = vadd.f32 %v589_v62, %v588_v61 }
 0x125   : > { %v1761_v42 = vpop.f32.mrf.mxu0  ;;  %v1763_v43 = vpop.f32.mrf.mxu1 }
 0x126   : > { %v566_v44 = vmul.f32 %v1749_v35, %v1761_v42  ;;  %v567_v45 = vmul.f32 %v1751_v36, %v1763_v43 }
 0x128   : > { %v576_v46 = vadd.f32 %v567_v45, %v566_v44  ;;  %v590_v55 = vmul.f32 %v566_v44, %v566_v44  ;;  %v591_v56 = vmul.f32 %v567_v45, %v567_v45 }
 0x12a   : > { %577 = vadd.xlane.f32.xlu2 %v576_v46  ;;  %v600_v57 = vadd.f32 %v591_v56, %v590_v55 }
 0x12d   : > { %v1769_v47 = vpop.f32.mrf.mxu0  ;;  %v1771_v48 = vpop.f32.mrf.mxu1 }
 0x12e   : > { %v568_v49 = vmul.f32 %v1749_v35, %v1769_v47  ;;  %v569_v50 = vmul.f32 %v1751_v36, %v1771_v48 }
 0x130   : > { %v592_v51 = vmul.f32 %v568_v49, %v568_v49  ;;  %v593_v52 = vmul.f32 %v569_v50, %v569_v50  ;;  %v579_v53 = vadd.f32 %v569_v50, %v568_v49 }
 0x132   : > { %580 = vadd.xlane.f32.xlu2 %v579_v53  ;;  %v603_v54 = vadd.f32 %v593_v52, %v592_v51 }
 0x134   : > { %604 = vadd.xlane.f32.xlu0 %v603_v54 }
 0x13a   : > { %601 = vadd.xlane.f32.xlu2 %v600_v57 }
 0x142   : > { %571 = vadd.xlane.f32.xlu2 %v570_v60 }
 0x14a   : > { %598 = vadd.xlane.f32.xlu2 %v597_v63 }
 0x152   : > { %595 = vadd.xlane.f32.xlu2 %v594_v2 }
 0x195   : > { %v575_v19 = vpop.xlane.xlu1 %574 }
 0x196   : > { %v1789_v21 = vmul.f32 0.055555556, %v575_v19 }
 0x198   : > { %v611_v26 = vmul.f32 %v1789_v21, %v1789_v21 }
 0x19d   : > { %v578_v3 = vpop.xlane.xlu2 %577 }
 0x19e   : > { %v1781_v6 = vmul.f32 0.055555556, %v578_v3 }
 0x1a0   : > { %v612_v9 = vmul.f32 %v1781_v6, %v1781_v6 }
 0x1a5   : > { %v581_v4 = vpop.xlane.xlu2 %580 }
 0x1a6   : > { %v1785_v10 = vmul.f32 0.055555556, %v581_v4 }
 0x1a7   : > { %v605_v12 = vpop.xlane.xlu0 %604 }
 0x1a8   : > { %v613_v14 = vmul.f32 %v1785_v10, %v1785_v10  ;;  %v609_v15 = vmul.f32 0.055555556, %v605_v12  ;;  %v428_v12 = vld [vmem:[%s399_s23 + $0x10] sm:$0xff] }
 0x1aa   : > { %v617_v18 = vsub.f32 %v609_v15, %v613_v14  ;;  %v425_v15 = vld [vmem:[%s1799_s20 + $0x18] sm:$0xff] }
 0x1ac   : > { %v621_v22 = vadd.f32 1e-05, %v617_v18 }
 0x1ad   : > { %v602_v8 = vpop.xlane.xlu2 %601 }
 0x1ae   : > { %v608_v11 = vmul.f32 0.055555556, %v602_v8  ;;  %vm658_vm10 = vweird.f32 %v621_v22 }
 0x1b0   : > { %v616_v13 = vsub.f32 %v608_v11, %v612_v9 }
 0x1b2   : > { %v620_v16 = vadd.f32 1e-05, %v616_v13  ;;  %v422_v13 = vld [vmem:[%s1799_s20] sm:$0xff] }
 0x1b4   : > { %1611 = vrsqrt.f32 %v620_v16  ;;  %vm648_vm4 = vweird.f32 %v620_v16 }
 0x1b5   : > { %v572_v17 = vpop.xlane.xlu2 %571  ;;  %1613 = vrsqrt.f32 %v621_v22 }
 0x1b6   : > { %v1793_v31 = vmul.f32 0.055555556, %v572_v17 }
 0x1b8   : > { %v610_v46 = vmul.f32 %v1793_v31, %v1793_v31 }
 0x1ba   : > { %v1612_v20 = vpop.eup %1611 }
 0x1bb   : > { %v643_v23 = vmul.f32 %v1612_v20, %v620_v16  ;;  %vm649_vm3 = vweird.f32 %v1612_v20  ;;  %v1614_v41 = vpop.eup %1613 }
 0x1bc   : > { %vm650_vm5 = vmor %vm648_vm4, %vm649_vm3  ;;  %v653_v51 = vmul.f32 %v1614_v41, %v621_v22  ;;  %vm659_vm9 = vweird.f32 %v1614_v41 }
 0x1bd   : > { %v644_v24 = vmul.f32 %v1612_v20, %v643_v23  ;;  %v599_v25 = vpop.xlane.xlu2 %598  ;;  %vm660_vm12 = vmor %vm658_vm10, %vm659_vm9  ;;  %v429_v23 = vld [vmem:[%s399_s23 + $0x18] sm:$0xff] }
 0x1be   : > { %v607_v27 = vmul.f32 0.055555556, %v599_v25  ;;  %v654_v55 = vmul.f32 %v1614_v41, %v653_v51 }
 0x1bf   : > { %v645_v28 = vmul.f32 0.5, %v644_v24 }
 0x1c0   : > { %v615_v29 = vsub.f32 %v607_v27, %v611_v26  ;;  %v655_v58 = vmul.f32 0.5, %v654_v55  ;;  %v427_v26 = vld [vmem:[%s399_s23 + $0x8] sm:$0xff]  ;;  %v426_v27 = vld [vmem:[%s399_s23] sm:$0xff] }
 0x1c1   : > { %v646_v30 = vsub.f32 1.5, %v645_v28 }
 0x1c2   : > { %v619_v34 = vadd.f32 1e-05, %v615_v29  ;;  %v656_v62 = vsub.f32 1.5, %v655_v58 }
 0x1c3   : > { %v647_v40 = vmul.f32 %v1612_v20, %v646_v30 }
 0x1c4   : > { %1615 = vrsqrt.f32 %v619_v34  ;;  %vm638_vm7 = vweird.f32 %v619_v34  ;;  %v657_v8 = vmul.f32 %v1614_v41, %v656_v62 }
 0x1c5   : > { %v596_v44 = vpop.xlane.xlu2 %595  ;;  %v651_v45 = vsel %vm650_vm5, %v1612_v20, %v647_v40 }
 0x1c6   : > { %v606_v49 = vmul.f32 0.055555556, %v596_v44  ;;  %v664_v50 = vmul.f32 %v651_v45, %v424_v39  ;;  %v661_v16 = vsel %vm660_vm12, %v1614_v41, %v657_v8 }
 0x1c7   : > { %v665_v20 = vmul.f32 %v661_v16, %v425_v15 }
 0x1c8   : > { %v614_v52 = vsub.f32 %v606_v49, %v610_v46  ;;  %686 = vperm.xlu0 %1568, %v664_v50   ;;  %v668_v11 = vmul.f32 %v664_v50, %v1781_v6 }
 0x1c9   : > { %v669_v22 = vmul.f32 %v665_v20, %v1785_v10 }
 0x1ca   : > { %v1616_v53 = vpop.eup %1615  ;;  %v618_v54 = vadd.f32 1e-05, %v614_v52  ;;  %v672_v18 = vsub.f32 %v428_v12, %v668_v11 }
 0x1cb   : > { %v633_v56 = vmul.f32 %v1616_v53, %v619_v34  ;;  %vm639_vm6 = vweird.f32 %v1616_v53  ;;  %v673_v24 = vsub.f32 %v429_v23, %v669_v22 }
 0x1cc   : > { %1617 = vrsqrt.f32 %v618_v54  ;;  %vm640_vm8 = vmor %vm638_vm7, %vm639_vm6  ;;  %vm628_vm13 = vweird.f32 %v618_v54 }
 0x1cd   : > { %v634_v57 = vmul.f32 %v1616_v53, %v633_v56 }
 0x1cf   : > { %v635_v59 = vmul.f32 0.5, %v634_v57 }
 0x1d1   : > { %v636_v60 = vsub.f32 1.5, %v635_v59 }
 0x1d2   : > { %v1618_v61 = vpop.eup %1617 }
 0x1d3   : > { %v623_v63 = vmul.f32 %v1618_v61, %v618_v54  ;;  %v637_v1 = vmul.f32 %v1616_v53, %v636_v60  ;;  %vm629_vm11 = vweird.f32 %v1618_v61 }
 0x1d4   : > { %vm630_vm14 = vmor %vm628_vm13, %vm629_vm11 }
 0x1d5   : > { %v624_v2 = vmul.f32 %v1618_v61, %v623_v63  ;;  %v641_v3 = vsel %vm640_vm8, %v1616_v53, %v637_v1 }
 0x1d6   : > { %v663_v4 = vmul.f32 %v641_v3, %v423_v0 }
 0x1d7   : > { %v625_v5 = vmul.f32 0.5, %v624_v2 }
 0x1d8   : > { %681 = vperm.xlu2 %1569, %v663_v4   ;;  %v667_v6 = vmul.f32 %v663_v4, %v1789_v21 }
 0x1d9   : > { %v626_v9 = vsub.f32 1.5, %v625_v5 }
 0x1da   : > { %v671_v28 = vsub.f32 %v427_v26, %v667_v6 }
 0x1db   : > { %v627_v14 = vmul.f32 %v1618_v61, %v626_v9 }
 0x1dd   : > { %v631_v17 = vsel %vm630_vm14, %v1618_v61, %v627_v14 }
 0x1de   : > { %v662_v19 = vmul.f32 %v631_v17, %v422_v13 }
 0x1e0   : > { %714 = vperm.xlu2 %1569, %v672_v18   ;;  %676 = vperm.xlu1 %1570, %v662_v19   ;;  %v666_v25 = vmul.f32 %v662_v19, %v1793_v31 }
 0x1e2   : > { %v670_v29 = vsub.f32 %v426_v27, %v666_v25 }
 0x1e8   : > { %691 = vperm.xlu2 %1569, %v665_v20   ;;  %719 = vperm.xlu1 %1570, %v673_v24  }
 0x1f0   : > { %709 = vperm.xlu2 %1569, %v671_v28   ;;  %704 = vperm.xlu1 %1570, %v670_v29  }
 0x232   : > { %v682_v30 = vpop.permute.xlu2 %681 }
 0x233   : > { %v696_v58 = vmul.f32 %v682_v30, %v1753_v37  ;;  %v697_v62 = vmul.f32 %v682_v30, %v1755_v38 }
 0x23a   : > { %v687_v34 = vpop.permute.xlu0 %686  ;;  %v715_v39 = vpop.permute.xlu2 %714 }
 0x23b   : > { %v698_v40 = vmul.f32 %v687_v34, %v1761_v42  ;;  %v699_v10 = vmul.f32 %v687_v34, %v1763_v43 }
 0x23d   : > { %v1817_v41 = vadd.f32 %v715_v39, %v698_v40  ;;  %v1819_v44 = vadd.f32 %v715_v39, %v699_v10 }
 0x23f   : > { %v1822_v21 = vmul.f32 0.70710677, %v1817_v41  ;;  %v1825_v31 = vmul.f32 0.70710677, %v1819_v44 }
 0x241   : > { %v906_v45 = vmul.f32 %v1822_v21, %v1822_v21  ;;  %v946_v46 = vmul.f32 %v1825_v31, %v1825_v31 }
 0x242   : > { %v1831_v49 = vpop.permute.xlu2 %691 }
 0x243   : > { %v907_v42 = vmin.f32 %v906_v45, 16.0  ;;  %v947_v43 = vmin.f32 %v946_v46, 16.0 }
 0x245   : > { %v908_v50 = vmul.f32 2.1237322e-06, %v907_v42  ;;  %v919_v51 = vmul.f32 3.8918573e-05, %v907_v42  ;;  %v948_v52 = vmul.f32 2.1237322e-06, %v947_v43 }
 0x246   : > { %v959_v53 = vmul.f32 3.8918573e-05, %v947_v43 }
 0x247   : > { %v909_v54 = vadd.f32 0.00028619796, %v908_v50  ;;  %v920_v55 = vadd.f32 0.001143296, %v919_v51  ;;  %v949_v56 = vadd.f32 0.00028619796, %v948_v52 }
 0x248   : > { %v960_v57 = vadd.f32 0.001143296, %v959_v53 }
 0x249   : > { %v910_v59 = vmul.f32 %v909_v54, %v907_v42  ;;  %v921_v60 = vmul.f32 %v920_v55, %v907_v42  ;;  %v950_v61 = vmul.f32 %v949_v56, %v947_v43 }
 0x24a   : > { %v961_v63 = vmul.f32 %v960_v57, %v947_v43  ;;  %v710_v0 = vpop.permute.xlu2 %709 }
 0x24b   : > { %v911_v1 = vadd.f32 0.0036580483, %v910_v59  ;;  %v922_v2 = vadd.f32 0.014752088, %v921_v60  ;;  %v951_v3 = vadd.f32 0.0036580483, %v950_v61  ;;  %v1835_v4 = vadd.f32 %v710_v0, %v696_v58 }
 0x24c   : > { %v962_v5 = vadd.f32 0.014752088, %v961_v63  ;;  %v1837_v8 = vadd.f32 %v710_v0, %v697_v62  ;;  %v700_v60 = vmul.f32 %v1831_v49, %v1769_v47  ;;  %v701_v61 = vmul.f32 %v1831_v49, %v1771_v48 }
 0x24d   : > { %v912_v9 = vmul.f32 %v911_v1, %v907_v42  ;;  %v923_v11 = vmul.f32 %v922_v2, %v907_v42  ;;  %v952_v12 = vmul.f32 %v951_v3, %v947_v43  ;;  %v1840_v37 = vmul.f32 0.70710677, %v1835_v4 }
 0x24e   : > { %v963_v13 = vmul.f32 %v962_v5, %v947_v43  ;;  %v1843_v14 = vmul.f32 0.70710677, %v1837_v8 }
 0x24f   : > { %v913_v38 = vadd.f32 0.05243302, %v912_v9  ;;  %v924_v15 = vadd.f32 0.112945676, %v923_v11  ;;  %v953_v16 = vadd.f32 0.05243302, %v952_v12  ;;  %v826_v18 = vmul.f32 %v1840_v37, %v1840_v37 }
 0x250   : > { %v964_v17 = vadd.f32 0.112945676, %v963_v13  ;;  %v866_v19 = vmul.f32 %v1843_v14, %v1843_v14 }
 0x251   : > { %v914_v20 = vmul.f32 %v913_v38, %v907_v42  ;;  %v925_v22 = vmul.f32 %v924_v15, %v907_v42  ;;  %v954_v23 = vmul.f32 %v953_v16, %v947_v43  ;;  %v1849_v6 = vmin.f32 %v826_v18, 16.0 }
 0x252   : > { %v965_v24 = vmul.f32 %v964_v17, %v947_v43  ;;  %v1851_v25 = vmin.f32 %v866_v19, 16.0  ;;  %v1853_v26 = vpop.permute.xlu1 %676 }
 0x253   : > { %v915_v27 = vadd.f32 0.18741608, %v914_v20  ;;  %v926_v28 = vadd.f32 0.4994258, %v925_v22  ;;  %v828_v30 = vmul.f32 2.1237322e-06, %v1849_v6 }
 0x254   : > { %v966_v29 = vadd.f32 0.4994258, %v965_v24  ;;  %v839_v34 = vmul.f32 3.8918573e-05, %v1849_v6  ;;  %v955_v10 = vadd.f32 0.18741608, %v954_v23 }
 0x255   : > { %v916_v39 = vmul.f32 %v915_v27, %v907_v42  ;;  %v927_v40 = vmul.f32 %v926_v28, %v907_v42  ;;  %v868_v45 = vmul.f32 2.1237322e-06, %v1851_v25  ;;  %v829_v50 = vadd.f32 0.00028619796, %v828_v30 }
 0x256   : > { %v967_v46 = vmul.f32 %v966_v29, %v947_v43  ;;  %v840_v51 = vadd.f32 0.001143296, %v839_v34  ;;  %v879_v53 = vmul.f32 3.8918573e-05, %v1851_v25  ;;  %v956_v59 = vmul.f32 %v955_v10, %v947_v43 }
 0x257   : > { %v928_v52 = vadd.f32 1.0, %v927_v40  ;;  %v830_v55 = vmul.f32 %v829_v50, %v1849_v6  ;;  %v869_v57 = vadd.f32 0.00028619796, %v868_v45  ;;  %v917_v58 = vadd.f32 1.1283791, %v916_v39 }
 0x258   : > { %v1859_v54 = vadd.f32 1.0, %v967_v46  ;;  %v841_v56 = vmul.f32 %v840_v51, %v1849_v6  ;;  %v880_v2 = vadd.f32 0.001143296, %v879_v53  ;;  %v957_v5 = vadd.f32 1.1283791, %v956_v59 }
 0x259   : > { %1619 = vrcp.f32 %v928_v52  ;;  %v831_v62 = vadd.f32 0.0036580483, %v830_v55  ;;  %v938_v63 = vand.u32 2147483647, %v928_v52  ;;  %v870_v1 = vmul.f32 %v869_v57, %v1851_v25 }
 0x25a   : > { %1621 = vrcp.f32 %v1859_v54  ;;  %v720_v42 = vpop.permute.xlu1 %719  ;;  %v842_v0 = vadd.f32 0.014752088, %v841_v56  ;;  %v918_v3 = vmul.f32 %v917_v58, %v1822_v21  ;;  %vm934_vm15 = vweird.f32 %v928_v52 }
 0x25b   : > { %v832_v43 = vmul.f32 %v831_v62, %v1849_v6  ;;  %v1871_v9 = vadd.f32 %v720_v42, %v700_v60  ;;  %v940_v11 = vand.u32 2147483648, %v928_v52  ;;  %v871_v12 = vadd.f32 0.0036580483, %v870_v1 }
 0x25c   : > { %v843_v47 = vmul.f32 %v842_v0, %v1849_v6  ;;  %v881_v48 = vmul.f32 %v880_v2, %v1851_v25  ;;  %vm974_vm2 = vweird.f32 %v1859_v54  ;;  %v978_v13 = vand.u32 2147483647, %v1859_v54 }
 0x25d   : > { %v833_v38 = vadd.f32 0.05243302, %v832_v43  ;;  %v1877_v15 = vadd.f32 %v720_v42, %v701_v61  ;;  %vm1879_vm3 = vcmp.eq.f32.partialorder %v938_v63, 8.507059e+37  ;;  %v872_v19 = vmul.f32 %v871_v12, %v1851_v25 }
 0x25e   : > { %v844_v18 = vadd.f32 0.112945676, %v843_v47  ;;  %v1885_v20 = vmul.f32 0.70710677, %v1871_v9  ;;  %v980_v23 = vand.u32 2147483648, %v1859_v54  ;;  %v941_v29 = vor.u32 1.1754944e-38, %v940_v11 }
 0x25f   : > { %v1620_v49 = vpop.eup %1619  ;;  %v834_v24 = vmul.f32 %v833_v38, %v1849_v6  ;;  %v882_v27 = vadd.f32 0.014752088, %v881_v48  ;;  %v873_v34 = vadd.f32 0.05243302, %v872_v19  ;;  %v1893_v10 = vmul.f32 0.70710677, %v1877_v15 }
 0x260   : > { %v1622_v21 = vpop.eup %1621  ;;  %v930_v16 = vmul.f32 %v1620_v49, %v928_v52  ;;  %v845_v30 = vmul.f32 %v844_v18, %v1849_v6  ;;  %vm935_vm4 = vweird.f32 %v1620_v49  ;;  %v986_v51 = vmul.f32 %v1885_v20, %v1885_v20 }
 0x261   : > { %v970_v22 = vmul.f32 %v1622_v21, %v1859_v54  ;;  %v883_v40 = vmul.f32 %v882_v27, %v1851_v25  ;;  %v874_v50 = vmul.f32 %v873_v34, %v1851_v25  ;;  %vm975_vm5 = vweird.f32 %v1622_v21  ;;  %vm936_vm7 = vmor %vm934_vm15, %vm935_vm4 }
 0x262   : > { %v931_v28 = vsub.f32 1.0, %v930_v16  ;;  %v846_v46 = vadd.f32 0.4994258, %v845_v30  ;;  %v835_v55 = vadd.f32 0.18741608, %v834_v24  ;;  %vm1898_vm6 = vcmp.eq.f32.partialorder %v978_v13, 8.507059e+37  ;;  %vm976_vm8 = vmor %vm974_vm2, %vm975_vm5  ;;  %v705_v27 = vpop.permute.xlu1 %704 }
 0x263   : > { %v971_v39 = vsub.f32 1.0, %v970_v22  ;;  %v884_v56 = vadd.f32 0.112945676, %v883_v40  ;;  %v1903_v42 = vmin.f32 %v986_v51, 16.0  ;;  %v875_v61 = vadd.f32 0.18741608, %v874_v50 }
 0x264   : > { %v932_v45 = vmul.f32 %v1620_v49, %v931_v28  ;;  %v847_v59 = vmul.f32 %v846_v46, %v1849_v6  ;;  %v1026_v63 = vmul.f32 %v1893_v10, %v1893_v10  ;;  %v981_v1 = vor.u32 1.1754944e-38, %v980_v23 }
 0x265   : > { %v972_v53 = vmul.f32 %v1622_v21, %v971_v39  ;;  %v885_v62 = vmul.f32 %v884_v56, %v1851_v25  ;;  %v988_v43 = vmul.f32 2.1237322e-06, %v1903_v42  ;;  %v836_v47 = vmul.f32 %v835_v55, %v1849_v6 }
 0x266   : > { %v933_v57 = vadd.f32 %v1620_v49, %v932_v45  ;;  %v1912_v2 = vadd.f32 1.0, %v847_v59  ;;  %v958_v13 = vmul.f32 %v957_v5, %v1825_v31  ;;  %v876_v54 = vmul.f32 %v875_v61, %v1851_v25 }
 0x267   : > { %v973_v60 = vadd.f32 %v1622_v21, %v972_v53  ;;  %v886_v12 = vadd.f32 0.4994258, %v885_v62  ;;  %v1923_v38 = vmin.f32 %v1026_v63, 16.0  ;;  %v989_v18 = vadd.f32 0.00028619796, %v988_v43 }
 0x268   : > { %v937_v0 = vsel %vm936_vm7, %v1620_v49, %v933_v57  ;;  %1623 = vrcp.f32 %v1912_v2  ;;  %v734_v6 = vmul.f32 0.5, %v1817_v41  ;;  %v837_v31 = vadd.f32 1.1283791, %v836_v47 }
 0x269   : > { %v942_v52 = vsel %vm1879_vm3, %v941_v29, %v937_v0  ;;  %v977_v11 = vsel %vm976_vm8, %v1622_v21, %v973_v60  ;;  %v887_v17 = vmul.f32 %v886_v12, %v1851_v25  ;;  %v999_v21 = vmul.f32 3.8918573e-05, %v1903_v42 }
 0x26a   : > { %v943_v48 = vmul.f32 %v942_v52, %v918_v3  ;;  %v982_v49 = vsel %vm1898_vm6, %v981_v1, %v977_v11  ;;  %v1929_v3 = vmul.f32 0.5, %v1819_v44  ;;  %v858_v5 = vand.u32 2147483647, %v1912_v2 }
 0x26b   : > { %v983_v16 = vmul.f32 %v982_v49, %v958_v13  ;;  %v1932_v22 = vadd.f32 1.0, %v887_v17  ;;  %v990_v23 = vmul.f32 %v989_v18, %v1903_v42  ;;  %v1000_v24 = vadd.f32 0.001143296, %v999_v21 }
 0x26c   : > { %v1522_v19 = vclamps-f32 %v943_v48, 1.0  ;;  %v860_v25 = vand.u32 2147483648, %v1912_v2  ;;  %v877_v28 = vadd.f32 1.1283791, %v876_v54  ;;  %v694_v29 = vmul.f32 %v1853_v26, %v1742_v32 }
 0x26d   : > { %v1028_v41 = vmul.f32 2.1237322e-06, %v1923_v38  ;;  %v1523_v30 = vclamps-f32 %v983_v16, 1.0  ;;  %1625 = vrcp.f32 %v1932_v22  ;;  %v695_v34 = vmul.f32 %v1853_v26, %v1744_v33 }
 0x26e   : > { %v1624_v44 = vpop.eup %1623  ;;  %v1039_v39 = vmul.f32 3.8918573e-05, %v1923_v38  ;;  %v838_v40 = vmul.f32 %v837_v31, %v1840_v37  ;;  %vm854_vm9 = vweird.f32 %v1912_v2  ;;  %v1946_v46 = vadd.f32 %v705_v27, %v694_v29 }
 0x26f   : > { %v850_v45 = vmul.f32 %v1624_v44, %v1912_v2  ;;  %v1070_v32 = vadd.f32 1.0, %v1522_v19  ;;  %vm1948_vm10 = vcmp.eq.f32.partialorder %v858_v5, 8.507059e+37  ;;  %v991_v51 = vadd.f32 0.0036580483, %v990_v23 }
 0x270   : > { %v1001_v53 = vmul.f32 %v1000_v24, %v1903_v42  ;;  %v861_v33 = vor.u32 1.1754944e-38, %v860_v25  ;;  %v878_v26 = vmul.f32 %v877_v28, %v1843_v14  ;;  %v1029_v56 = vadd.f32 0.00028619796, %v1028_v41 }
 0x271   : > { %v851_v55 = vsub.f32 1.0, %v850_v45  ;;  %v1071_v37 = vadd.f32 1.0, %v1523_v30  ;;  %v992_v57 = vmul.f32 %v991_v51, %v1903_v42  ;;  %v1040_v59 = vadd.f32 0.001143296, %v1039_v39 }
 0x272   : > { %v1002_v58 = vadd.f32 0.014752088, %v1001_v53  ;;  %vm855_vm11 = vweird.f32 %v1624_v44  ;;  %v1030_v61 = vmul.f32 %v1029_v56, %v1923_v38  ;;  %v1957_v62 = vmul.f32 0.70710677, %v1946_v46 }
 0x273   : > { %v852_v60 = vmul.f32 %v1624_v44, %v851_v55  ;;  %v1626_v63 = vpop.eup %1625  ;;  %v1078_v0 = vmul.f32 %v1070_v32, %v734_v6  ;;  %v898_v1 = vand.u32 2147483647, %v1932_v22  ;;  %v1041_v14 = vmul.f32 %v1040_v59, %v1923_v38  ;;  %vm856_vm12 = vmor %vm854_vm9, %vm855_vm11 }
 0x274   : > { %v1003_v43 = vmul.f32 %v1002_v58, %v1903_v42  ;;  %v890_v11 = vmul.f32 %v1626_v63, %v1932_v22  ;;  %v993_v47 = vadd.f32 0.05243302, %v992_v57  ;;  %v1031_v12 = vadd.f32 0.0036580483, %v1030_v61 }
 0x275   : > { %v853_v52 = vadd.f32 %v1624_v44, %v852_v60  ;;  %v900_v48 = vand.u32 2147483648, %v1932_v22  ;;  %v1042_v49 = vadd.f32 0.014752088, %v1041_v14  ;;  %v1966_v54 = vadd.f32 %v705_v27, %v695_v34 }
 0x276   : > { %v1004_v13 = vadd.f32 0.112945676, %v1003_v43  ;;  %v891_v17 = vsub.f32 1.0, %v890_v11  ;;  %vm895_vm13 = vweird.f32 %v1626_v63  ;;  %v746_v18 = vmul.f32 %v1957_v62, %v1957_v62 }
 0x277   : > { %v857_v16 = vsel %vm856_vm12, %v1624_v44, %v853_v52  ;;  %v1032_v2 = vmul.f32 %v1031_v12, %v1923_v38  ;;  %v1043_v31 = vmul.f32 %v1042_v49, %v1923_v38  ;;  %v994_v23 = vmul.f32 %v993_v47, %v1903_v42 }
 0x278   : > { %v862_v21 = vsel %vm1948_vm10, %v861_v33, %v857_v16  ;;  %v1005_v6 = vmul.f32 %v1004_v13, %v1903_v42  ;;  %v892_v19 = vmul.f32 %v1626_v63, %v891_v17  ;;  %v1976_v24 = vmin.f32 %v746_v18, 16.0 }
 0x279   : > { %v863_v5 = vmul.f32 %v862_v21, %v838_v40  ;;  %v1079_v27 = vmul.f32 %v1071_v37, %v1929_v3  ;;  %vm894_vm14 = vweird.f32 %v1932_v22  ;;  %v1044_v28 = vadd.f32 0.112945676, %v1043_v31 }
 0x27a   : > { %v1006_v25 = vadd.f32 0.4994258, %v1005_v6  ;;  %v893_v41 = vadd.f32 %v1626_v63, %v892_v19  ;;  %v901_v44 = vor.u32 1.1754944e-38, %v900_v48  ;;  %v748_v30 = vmul.f32 2.1237322e-06, %v1976_v24  ;;  %vm896_vm15 = vmor %vm894_vm14, %vm895_vm13 }
 0x27b   : > { %v1520_v29 = vclamps-f32 %v863_v5, 1.0  ;;  %v1033_v39 = vadd.f32 0.05243302, %v1032_v2  ;;  %v1045_v40 = vmul.f32 %v1044_v28, %v1923_v38  ;;  %v1985_v45 = vmul.f32 0.70710677, %v1966_v54 }
 0x27c   : > { %v1007_v34 = vmul.f32 %v1006_v25, %v1903_v42  ;;  %v897_v3 = vsel %vm896_vm15, %v1626_v63, %v893_v41  ;;  %vm899_vm2 = vcmp.eq.f32.partialorder %v898_v1, 8.507059e+37  ;;  %v995_v32 = vadd.f32 0.18741608, %v994_v23 }
 0x27d   : > { %v1068_v22 = vadd.f32 1.0, %v1520_v29  ;;  %v902_v50 = vsel %vm899_vm2, %v901_v44, %v897_v3  ;;  %v1046_v53 = vadd.f32 0.4994258, %v1045_v40  ;;  %v759_v55 = vmul.f32 3.8918573e-05, %v1976_v24 }
 0x27e   : > { %v1008_v51 = vadd.f32 1.0, %v1007_v34  ;;  %v1989_v33 = vmul.f32 %v1078_v0, %v1749_v35  ;;  %v732_v56 = vmul.f32 0.5, %v1835_v4  ;;  %v903_v37 = vmul.f32 %v902_v50, %v878_v26 }
 0x27f   : > { %v749_v57 = vadd.f32 0.00028619796, %v748_v30  ;;  %v1993_v58 = vmul.f32 %v1079_v27, %v1751_v36  ;;  %v1034_v59 = vmul.f32 %v1033_v39, %v1923_v38  ;;  %v786_v60 = vmul.f32 %v1985_v45, %v1985_v45 }
 0x280   : > { %1627 = vrcp.f32 %v1008_v51  ;;  %v1521_v61 = vclamps-f32 %v903_v37, 1.0  ;;  %v1076_v63 = vmul.f32 %v1068_v22, %v732_v56  ;;  %v1047_v1 = vmul.f32 %v1046_v53, %v1923_v38 }
 0x281   : > { %v996_v0 = vmul.f32 %v995_v32, %v1903_v42  ;;  %v760_v43 = vadd.f32 0.001143296, %v759_v55  ;;  %v733_v4 = vmul.f32 0.5, %v1837_v8  ;;  %v750_v52 = vmul.f32 %v749_v57, %v1976_v24 }
 0x282   : > { %v1069_v26 = vadd.f32 1.0, %v1521_v61  ;;  %v2001_v14 = vadd.f32 1.0, %v1047_v1  ;;  %v1035_v11 = vadd.f32 0.18741608, %v1034_v59  ;;  %v2005_v12 = vmin.f32 %v786_v60, 16.0 }
 0x283   : > { %v761_v47 = vmul.f32 %v760_v43, %v1976_v24  ;;  %v1571_v48 = vpack.i.bf16 %v1993_v58, %v1989_v33  ;;  %v2010_v49 = vmul.f32 %v1076_v63, %v1749_v35  ;;  %v997_v42 = vadd.f32 1.1283791, %v996_v0 }
 0x284   : > { %v1077_v13 = vmul.f32 %v1069_v26, %v733_v4  ;;  %1629 = vrcp.f32 %v2001_v14  ;;  %v751_v21 = vadd.f32 0.0036580483, %v750_v52  ;;  %v1018_v6 = vand.u32 2147483647, %v1008_v51 }
 0x285   : > { %v762_v16 = vadd.f32 0.014752088, %v761_v47  ;;  %1572 = vrot.lane.b32.xlu0 %v1571_v48, %s1649_s11  ;;  %v1036_v2 = vmul.f32 %v1035_v11, %v1923_v38  ;;  %v788_v5 = vmul.f32 2.1237322e-06, %v2005_v12  ;;  %v1020_v23 = vand.u32 2147483648, %v1008_v51 }
 0x286   : > { %v1628_v8 = vpop.eup %1627  ;;  %v2015_v17 = vmul.f32 %v1077_v13, %v1751_v36  ;;  %v799_v27 = vmul.f32 3.8918573e-05, %v2005_v12  ;;  %v998_v28 = vmul.f32 %v997_v42, %v1885_v20  ;;  %vm1014_vm3 = vweird.f32 %v1008_v51 }
 0x287   : > { %v1010_v18 = vmul.f32 %v1628_v8, %v1008_v51  ;;  %v763_v31 = vmul.f32 %v762_v16, %v1976_v24  ;;  %v789_v41 = vadd.f32 0.00028619796, %v788_v5  ;;  %vm1015_vm4 = vweird.f32 %v1628_v8 }
 0x288   : > { %v2023_v25 = vpack.i.bf16 %v2015_v17, %v2010_v49  ;;  %v752_v38 = vmul.f32 %v751_v21, %v1976_v24  ;;  %v800_v34 = vadd.f32 0.001143296, %v799_v27  ;;  %vm2029_vm5 = vcmp.eq.f32.partialorder %v1018_v6, 8.507059e+37  ;;  %vm1016_vm6 = vmor %vm1014_vm3, %vm1015_vm4 }
 0x289   : > { %v1011_v19 = vsub.f32 1.0, %v1010_v18  ;;  %v764_v29 = vadd.f32 0.112945676, %v763_v31  ;;  %v1037_v40 = vadd.f32 1.1283791, %v1036_v2  ;;  %v1021_v32 = vor.u32 1.1754944e-38, %v1020_v23 }
 0x28a   : > { %v1630_v44 = vpop.eup %1629  ;;  %1577 = vrot.lane.b32.xlu1 %v2023_v25, %s1649_s11  ;;  %v790_v50 = vmul.f32 %v789_v41, %v2005_v12  ;;  %v801_v53 = vmul.f32 %v800_v34, %v2005_v12  ;;  %v1058_v56 = vand.u32 2147483647, %v2001_v14  ;;  %v1060_v37 = vand.u32 2147483648, %v2001_v14 }
 0x28b   : > { %v1012_v30 = vmul.f32 %v1628_v8, %v1011_v19  ;;  %v1050_v3 = vmul.f32 %v1630_v44, %v2001_v14  ;;  %v765_v20 = vmul.f32 %v764_v29, %v1976_v24  ;;  %vm1055_vm7 = vweird.f32 %v1630_v44 }
 0x28c   : > { %v753_v60 = vadd.f32 0.05243302, %v752_v38  ;;  %v802_v61 = vadd.f32 0.014752088, %v801_v53  ;;  %v791_v43 = vadd.f32 0.0036580483, %v790_v50  ;;  %v1038_v26 = vmul.f32 %v1037_v40, %v1893_v10 }
 0x28d   : > { %v1013_v22 = vadd.f32 %v1628_v8, %v1012_v30  ;;  %v1051_v55 = vsub.f32 1.0, %v1050_v3  ;;  %v766_v57 = vadd.f32 0.4994258, %v765_v20  ;;  %vm1054_vm8 = vweird.f32 %v2001_v14 }
 0x28e   : > { %v803_v51 = vmul.f32 %v802_v61, %v2005_v12  ;;  %vm1056_vm9 = vmor %vm1054_vm8, %vm1055_vm7  ;;  %v1061_v13 = vor.u32 1.1754944e-38, %v1060_v37  ;;  %vm1059_vm10 = vcmp.eq.f32.partialorder %v1058_v56, 8.507059e+37  ;;  %v792_v18 = vmul.f32 %v791_v43, %v2005_v12 }
 0x28f   : > { %v1017_v59 = vsel %vm1016_vm6, %v1628_v8, %v1013_v22  ;;  %v1052_v1 = vmul.f32 %v1630_v44, %v1051_v55  ;;  %v767_v0 = vmul.f32 %v766_v57, %v1976_v24  ;;  %v754_v8 = vmul.f32 %v753_v60, %v1976_v24 }
 0x290   : > { %v1022_v63 = vsel %vm2029_vm5, %v1021_v32, %v1017_v59  ;;  %v804_v42 = vadd.f32 0.112945676, %v803_v51  ;;  %v736_v10 = vmul.f32 0.5, %v1871_v9  ;;  %v793_v23 = vadd.f32 0.05243302, %v792_v18 }
 0x291   : > { %v1023_v4 = vmul.f32 %v1022_v63, %v998_v28  ;;  %v1053_v52 = vadd.f32 %v1630_v44, %v1052_v1  ;;  %v768_v11 = vadd.f32 1.0, %v767_v0  ;;  %v755_v31 = vadd.f32 0.18741608, %v754_v8 }
 0x292   : > { %1592 = vrot.lane.b32.xlu1 %v1571_v48, %s1650_s12  ;;  %v805_v14 = vmul.f32 %v804_v42, %v2005_v12  ;;  %v737_v48 = vmul.f32 0.5, %v1877_v15  ;;  %v794_v34 = vmul.f32 %v793_v23, %v2005_v12 }
 0x293   : > { %v1524_v47 = vclamps-f32 %v1023_v4, 1.0  ;;  %v1057_v16 = vsel %vm1056_vm9, %v1630_v44, %v1053_v52  ;;  %1631 = vrcp.f32 %v768_v11  ;;  %v756_v44 = vmul.f32 %v755_v31, %v1976_v24 }
 0x294   : > { %v1062_v21 = vsel %vm1059_vm10, %v1061_v13, %v1057_v16  ;;  %v806_v27 = vadd.f32 0.4994258, %v805_v14  ;;  %v780_v20 = vand.u32 2147483648, %v768_v11  ;;  %v778_v32 = vand.u32 2147483647, %v768_v11 }
 0x295   : > { %v1072_v6 = vadd.f32 1.0, %v1524_v47  ;;  %v1063_v2 = vmul.f32 %v1062_v21, %v1038_v26  ;;  %v757_v15 = vadd.f32 1.1283791, %v756_v44  ;;  %v795_v50 = vadd.f32 0.18741608, %v794_v34 }
 0x296   : > { %v807_v41 = vmul.f32 %v806_v27, %v2005_v12  ;;  %vm774_vm12 = vweird.f32 %v768_v11  ;;  %v781_v55 = vor.u32 1.1754944e-38, %v780_v20  ;;  %vm779_vm14 = vcmp.eq.f32.partialorder %v778_v32, 8.507059e+37 }
 0x297   : > { %v1525_v5 = vclamps-f32 %v1063_v2, 1.0  ;;  %v1080_v19 = vmul.f32 %v1072_v6, %v736_v10  ;;  %v758_v56 = vmul.f32 %v757_v15, %v1957_v62  ;;  %v796_v60 = vmul.f32 %v795_v50, %v2005_v12 }
 0x298   : > { %v808_v39 = vadd.f32 1.0, %v807_v41  ;;  %v730_v12 = vmul.f32 0.5, %v1946_v46  ;;  %v731_v21 = vmul.f32 0.5, %v1966_v54 }
 0x299   : > { %v1632_v28 = vpop.eup %1631  ;;  %v1073_v29 = vadd.f32 1.0, %v1525_v5  ;;  %v2055_v9 = vmul.f32 %v1080_v19, %v1749_v35  ;;  %v797_v0 = vadd.f32 1.1283791, %v796_v60 }
 0x29a   : > { %v770_v30 = vmul.f32 %v1632_v28, %v768_v11  ;;  %1633 = vrcp.f32 %v808_v39  ;;  %vm775_vm11 = vweird.f32 %v1632_v28  ;;  %v820_v43 = vand.u32 2147483648, %v808_v39 }
 0x29b   : > { %v1081_v38 = vmul.f32 %v1073_v29, %v737_v48  ;;  %vm776_vm13 = vmor %vm774_vm12, %vm775_vm11  ;;  %v818_v26 = vand.u32 2147483647, %v808_v39  ;;  %vm814_vm2 = vweird.f32 %v808_v39  ;;  %v798_v62 = vmul.f32 %v797_v0, %v1985_v45 }
 0x29c   : > { %v771_v40 = vsub.f32 1.0, %v770_v30  ;;  %v821_v11 = vor.u32 1.1754944e-38, %v820_v43 }
 0x29d   : > { %v2059_v3 = vmul.f32 %v1081_v38, %v1751_v36  ;;  %vm819_vm4 = vcmp.eq.f32.partialorder %v818_v26, 8.507059e+37 }
 0x29e   : > { %v772_v22 = vmul.f32 %v1632_v28, %v771_v40 }
 0x29f   : > { %v1601_v24 = vpack.i.bf16 %v2059_v3, %v2055_v9 }
 0x2a0   : > { %v773_v53 = vadd.f32 %v1632_v28, %v772_v22  ;;  %v1634_v57 = vpop.eup %1633 }
 0x2a1   : > { %1602 = vrot.lane.b32.xlu0 %v1601_v24, %s1650_s12  ;;  %1582 = vrot.lane.b32.xlu2 %v1601_v24, %s1649_s11  ;;  %v810_v63 = vmul.f32 %v1634_v57, %v808_v39  ;;  %vm815_vm15 = vweird.f32 %v1634_v57 }
 0x2a2   : > { %v777_v37 = vsel %vm776_vm13, %v1632_v28, %v773_v53  ;;  %vm816_vm3 = vmor %vm814_vm2, %vm815_vm15 }
 0x2a3   : > { %v782_v59 = vsel %vm779_vm14, %v781_v55, %v777_v37  ;;  %v811_v1 = vsub.f32 1.0, %v810_v63  ;;  %v1164_v63 = vld [vmem:[%s403_s29] sm:$0xff] }
 0x2a4   : > { %v783_v61 = vmul.f32 %v782_v59, %v758_v56 }
 0x2a5   : > { %v812_v51 = vmul.f32 %v1634_v57, %v811_v1 }
 0x2a6   : > { %v1518_v4 = vclamps-f32 %v783_v61, 1.0 }
 0x2a7   : > { %v813_v52 = vadd.f32 %v1634_v57, %v812_v51 }
 0x2a8   : > { %v1066_v13 = vadd.f32 1.0, %v1518_v4 }
 0x2a9   : > { %v817_v47 = vsel %vm816_vm3, %v1634_v57, %v813_v52 }
 0x2aa   : > { %v822_v8 = vsel %vm819_vm4, %v821_v11, %v817_v47  ;;  %v1074_v18 = vmul.f32 %v1066_v13, %v730_v12 }
 0x2ab   : > { %v823_v42 = vmul.f32 %v822_v8, %v798_v62 }
 0x2ac   : > { %v1082_v2 = vmul.f32 %v1074_v18, %v1749_v35 }
 0x2ad   : > { %v1519_v16 = vclamps-f32 %v823_v42, 1.0 }
 0x2af   : > { %v1067_v6 = vadd.f32 1.0, %v1519_v16 }
 0x2b1   : > { %v1075_v10 = vmul.f32 %v1067_v6, %v731_v21 }
 0x2b3   : > { %v1083_v14 = vmul.f32 %v1075_v10, %v1751_v36 }
 0x2b5   : > { %v1606_v31 = vpack.i.bf16 %v1083_v14, %v1082_v2 }
 0x2b7   : > { %1607 = vrot.lane.b32.xlu0 %v1606_v31, %s1650_s12  ;;  %1587 = vrot.lane.b32.xlu2 %v1606_v31, %s1649_s11 }
 0x2bf   : > { %1597 = vrot.lane.b32.xlu2 %v2023_v25, %s1650_s12 }
 0x2f7   : > { %v1573_v46 = vpop.permute.xlu0 %1572 }
 0x2f8   : > { %v1575_v5 = vunpack.i.h.bf16 %v1573_v46  ;;  %v1574_v19 = vunpack.i.l.bf16 %v1573_v46 }
 0x2fa   : > { %v1150_v25 = vsel %vm461_vm0, %v1574_v19, %v1575_v5  ;;  %v1154_v44 = vsel %vm461_vm0, %v1575_v5, %v1574_v19  ;;  %v1091_v5 = vld [vmem:[%s411_s13] sm:$0xff] }
 0x2fb   : > { %v1583_v45 = vpop.permute.xlu2 %1582 }
 0x2fc   : > { %v1585_v23 = vunpack.i.h.bf16 %v1583_v45  ;;  %v1584_v54 = vunpack.i.l.bf16 %v1583_v45  ;;  %v1578_v27 = vpop.permute.xlu1 %1577 }
 0x2fd   : > { %v1580_v28 = vunpack.i.h.bf16 %v1578_v27  ;;  %v1579_v48 = vunpack.i.l.bf16 %v1578_v27 }
 0x2fe   : > { %v1151_v29 = vsel %vm461_vm0, %v1584_v54, %v1585_v23  ;;  %v1155_v41 = vsel %vm461_vm0, %v1585_v23, %v1584_v54 }
 0x2ff   : > { %1197 = vmatpush.msra.mxu2 %v1151_v29  ;;  %1217 = vmatpush.msra.mxu3 %v1155_v41  ;;  %v1149_v30 = vsel %vm461_vm0, %v1579_v48, %v1580_v28  ;;  %v1153_v38 = vsel %vm461_vm0, %v1580_v28, %v1579_v48 }
 0x301   : > { %1198 = vmatpush.msra.mxu2 %v1150_v25  ;;  %1218 = vmatpush.msra.mxu3 %v1154_v44 }
 0x303   : > { %1199 = vmatpush.msra.mxu2 %v1149_v30  ;;  %1219 = vmatpush.msra.mxu3 %v1153_v38 }
 0x304   : > { %v1593_v24 = vpop.permute.xlu1 %1592 }
 0x305   : > { %v1595_v55 = vunpack.i.h.bf16 %v1593_v24  ;;  %v1594_v56 = vunpack.i.l.bf16 %v1593_v24 }
 0x311   : > { %v1588_v34 = vpop.permute.xlu2 %1587 }
 0x312   : > { %v1590_v39 = vunpack.i.h.bf16 %v1588_v34  ;;  %v1589_v40 = vunpack.i.l.bf16 %v1588_v34 }
 0x313   : > { %v1603_v22 = vpop.permute.xlu0 %1602 }
 0x314   : > { %v1148_v20 = vsel %vm461_vm0, %v1589_v40, %v1590_v39  ;;  %v1152_v15 = vsel %vm461_vm0, %v1590_v39, %v1589_v40  ;;  %v1605_v32 = vunpack.i.h.bf16 %v1603_v22  ;;  %v1604_v50 = vunpack.i.l.bf16 %v1603_v22 }
 0x315   : > { %1200 = vmatpush.msra.mxu2 %v1148_v20  ;;  %1220 = vmatpush.msra.mxu3 %v1152_v15  ;;  %vm1189_vm0 = vcmask 785408  }
 0x316   : > { %v1115_v37 = vsel %vm440_vm1, %v1605_v32, %v1604_v50 }
 0x317   : > { %1201 = vmatpush.msra.mxu2 %v2055_v9  ;;  %1221 = vmatpush.msra.mxu3 %v2059_v3  ;;  %v1111_v9 = vsel %vm440_vm1, %v1604_v50, %v1605_v32 }
 0x319   : > { %1202 = vmatpush.msra.mxu2 %v1989_v33  ;;  %1222 = vmatpush.msra.mxu3 %v1993_v58  ;;  %v1598_v53 = vpop.permute.xlu2 %1597  ;;  %v1114_v58 = vsel %vm440_vm1, %v1595_v55, %v1594_v56 }
 0x31a   : > { %v1600_v3 = vunpack.i.h.bf16 %v1598_v53  ;;  %v1599_v33 = vunpack.i.l.bf16 %v1598_v53 }
 0x31b   : > { %1203 = vmatpush.msra.mxu2 %v2010_v49  ;;  %1223 = vmatpush.msra.mxu3 %v2015_v17  ;;  %v1110_v49 = vsel %vm440_vm1, %v1594_v56, %v1595_v55 }
 0x31c   : > { %v1113_v17 = vsel %vm440_vm1, %v1600_v3, %v1599_v33  ;;  %v1109_v57 = vsel %vm440_vm1, %v1599_v33, %v1600_v3 }
 0x31d   : > { %1204 = vmatpush.msra.mxu2 %v1082_v2  ;;  %1224 = vmatpush.msra.mxu3 %v1083_v14  ;;  %v1090_v2 = vld [vmem:[%s407_s10] sm:$0xff] }
 0x31f   : > { %1205 = vmatpush.msra.mxu2 %v1115_v37  ;;  %1225 = vmatpush.msra.mxu3 %v1111_v9 }
 0x321   : > { %1206 = vmatpush.msra.mxu2 %v1114_v58  ;;  %1226 = vmatpush.msra.mxu3 %v1110_v49 }
 0x323   : > { %1207 = vmatpush.msra.mxu2 %v1113_v17  ;;  %1227 = vmatpush.msra.mxu3 %v1109_v57 }
 0x329   : > { %v1608_v59 = vpop.permute.xlu0 %1607 }
 0x32a   : > { %v1610_v60 = vunpack.i.h.bf16 %v1608_v59  ;;  %v1609_v61 = vunpack.i.l.bf16 %v1608_v59 }
 0x32c   : > { %v1112_v1 = vsel %vm440_vm1, %v1610_v60, %v1609_v61  ;;  %v1108_v0 = vsel %vm440_vm1, %v1609_v61, %v1610_v60 }
 0x32d   : > { %1208 = vmatpush.msra.mxu2 %v1112_v1  ;;  %1228 = vmatpush.msra.mxu3 %v1108_v0 }
 0x32e   : > { %1526 = vmatmul.msk.f32.vlgmr.msra.gmra.mxu2 %vm1189_vm0, %v1164_v63  ;;  %1527 = vmatmul.msk.f32.vlgmr.msra.gmra.mxu3 %vm1189_vm0, %v1164_v63 }
 0x3b1   : > { %v1210_v43 = vpop.f32.mrf.mxu2  ;;  %v1230_v4 = vpop.f32.mrf.mxu3 }
 0x3b2   : > { %v1233_v51 = vmul.f32 %v1210_v43, %v1749_v35  ;;  %v1234_v26 = vmul.f32 %v1230_v4, %v1751_v36 }
 0x3b4   : > { %v1239_v52 = vmul.f32 %v1233_v51, %v1233_v51  ;;  %v1240_v11 = vmul.f32 %v1234_v26, %v1234_v26  ;;  %v1235_v62 = vadd.f32 %v1234_v26, %v1233_v51 }
 0x3b6   : > { %1236 = vadd.xlane.f32.xlu1 %v1235_v62  ;;  %v1241_v47 = vadd.f32 %v1240_v11, %v1239_v52 }
 0x3b8   : > { %1242 = vadd.xlane.f32.xlu2 %v1241_v47 }
 0x429   : > { %v1237_v13 = vpop.xlane.xlu1 %1236 }
 0x42a   : > { %v1238_v7 = vmul.f32 0.055555556, %v1237_v13 }
 0x42b   : > { %v1243_v8 = vpop.xlane.xlu2 %1242 }
 0x42c   : > { %v1245_v12 = vmul.f32 %v1238_v7, %v1238_v7  ;;  %v1244_v42 = vmul.f32 0.055555556, %v1243_v8 }
 0x42e   : > { %v1246_v16 = vsub.f32 %v1244_v42, %v1245_v12 }
 0x430   : > { %v1247_v18 = vadd.f32 1e-05, %v1246_v16 }
 0x432   : > { %1635 = vrsqrt.f32 %v1247_v18  ;;  %vm1254_vm5 = vweird.f32 %v1247_v18 }
 0x438   : > { %v1636_v21 = vpop.eup %1635 }
 0x439   : > { %v1249_v35 = vmul.f32 %v1636_v21, %v1247_v18  ;;  %vm1255_vm1 = vweird.f32 %v1636_v21 }
 0x43a   : > { %vm1256_vm6 = vmor %vm1254_vm5, %vm1255_vm1 }
 0x43b   : > { %v1250_v6 = vmul.f32 %v1636_v21, %v1249_v35 }
 0x43d   : > { %v1251_v36 = vmul.f32 0.5, %v1250_v6 }
 0x43f   : > { %v1252_v10 = vsub.f32 1.5, %v1251_v36 }
 0x441   : > { %v1253_v14 = vmul.f32 %v1636_v21, %v1252_v10 }
 0x443   : > { %v1257_v31 = vsel %vm1256_vm6, %v1636_v21, %v1253_v14 }
 0x444   : > { %v1258_v46 = vmul.f32 %v1257_v31, %v1090_v2 }
 0x446   : > { %1263 = vperm.xlu0 %1568, %v1258_v46   ;;  %v1259_v45 = vmul.f32 %v1258_v46, %v1238_v7 }
 0x448   : > { %v1260_v19 = vsub.f32 %v1091_v5, %v1259_v45 }
 0x44e   : > { %1270 = vperm.xlu0 %1568, %v1260_v19  }
 0x4b8   : > { %v1264_v23 = vpop.permute.xlu0 %1263 }
 0x4b9   : > { %v1266_v54 = vmul.f32 %v1264_v23, %v1210_v43  ;;  %v1267_v27 = vmul.f32 %v1264_v23, %v1230_v4 }
 0x4c0   : > { %v1271_v28 = vpop.permute.xlu0 %1270 }
 0x4c1   : > { %v2131_v48 = vadd.f32 %v1271_v28, %v1266_v54  ;;  %v2133_v29 = vadd.f32 %v1271_v28, %v1267_v27 }
 0x4c3   : > { %v2136_v41 = vmul.f32 0.70710677, %v2131_v48  ;;  %v2139_v25 = vmul.f32 0.70710677, %v2133_v29 }
 0x4c5   : > { %v1279_v44 = vmul.f32 %v2136_v41, %v2136_v41  ;;  %v1319_v30 = vmul.f32 %v2139_v25, %v2139_v25 }
 0x4c7   : > { %v1280_v38 = vmin.f32 %v1279_v44, 16.0  ;;  %v1320_v34 = vmin.f32 %v1319_v30, 16.0 }
 0x4c9   : > { %v1281_v39 = vmul.f32 2.1237322e-06, %v1280_v38  ;;  %v1292_v40 = vmul.f32 3.8918573e-05, %v1280_v38  ;;  %v1321_v20 = vmul.f32 2.1237322e-06, %v1320_v34 }
 0x4ca   : > { %v1332_v15 = vmul.f32 3.8918573e-05, %v1320_v34 }
 0x4cb   : > { %v1282_v22 = vadd.f32 0.00028619796, %v1281_v39  ;;  %v1293_v32 = vadd.f32 0.001143296, %v1292_v40  ;;  %v1322_v50 = vadd.f32 0.00028619796, %v1321_v20 }
 0x4cc   : > { %v1333_v24 = vadd.f32 0.001143296, %v1332_v15 }
 0x4cd   : > { %v1283_v53 = vmul.f32 %v1282_v22, %v1280_v38  ;;  %v1294_v55 = vmul.f32 %v1293_v32, %v1280_v38  ;;  %v1323_v56 = vmul.f32 %v1322_v50, %v1320_v34  ;;  %v1275_v50 = vmul.f32 0.5, %v2131_v48 }
 0x4ce   : > { %v1334_v37 = vmul.f32 %v1333_v24, %v1320_v34 }
 0x4cf   : > { %v1284_v9 = vadd.f32 0.0036580483, %v1283_v53  ;;  %v1295_v3 = vadd.f32 0.014752088, %v1294_v55  ;;  %v1324_v49 = vadd.f32 0.0036580483, %v1323_v56 }
 0x4d0   : > { %v1335_v33 = vadd.f32 0.014752088, %v1334_v37 }
 0x4d1   : > { %v1296_v58 = vmul.f32 %v1295_v3, %v1280_v38  ;;  %v1285_v57 = vmul.f32 %v1284_v9, %v1280_v38  ;;  %v1325_v63 = vmul.f32 %v1324_v49, %v1320_v34 }
 0x4d2   : > { %v1336_v17 = vmul.f32 %v1335_v33, %v1320_v34 }
 0x4d3   : > { %v1297_v59 = vadd.f32 0.112945676, %v1296_v58  ;;  %v1286_v0 = vadd.f32 0.05243302, %v1285_v57  ;;  %v1326_v26 = vadd.f32 0.05243302, %v1325_v63 }
 0x4d4   : > { %v1337_v60 = vadd.f32 0.112945676, %v1336_v17 }
 0x4d5   : > { %v1298_v61 = vmul.f32 %v1297_v59, %v1280_v38  ;;  %v1287_v11 = vmul.f32 %v1286_v0, %v1280_v38  ;;  %v1327_v13 = vmul.f32 %v1326_v26, %v1320_v34 }
 0x4d6   : > { %v1338_v1 = vmul.f32 %v1337_v60, %v1320_v34 }
 0x4d7   : > { %v1299_v43 = vadd.f32 0.4994258, %v1298_v61  ;;  %v1288_v7 = vadd.f32 0.18741608, %v1287_v11  ;;  %v1328_v8 = vadd.f32 0.18741608, %v1327_v13 }
 0x4d8   : > { %v1339_v4 = vadd.f32 0.4994258, %v1338_v1 }
 0x4d9   : > { %v1300_v51 = vmul.f32 %v1299_v43, %v1280_v38  ;;  %v1289_v42 = vmul.f32 %v1288_v7, %v1280_v38  ;;  %v1329_v21 = vmul.f32 %v1328_v8, %v1320_v34 }
 0x4da   : > { %v1340_v52 = vmul.f32 %v1339_v4, %v1320_v34 }
 0x4db   : > { %v1301_v62 = vadd.f32 1.0, %v1300_v51  ;;  %v1290_v36 = vadd.f32 1.1283791, %v1289_v42  ;;  %v1330_v45 = vadd.f32 1.1283791, %v1329_v21 }
 0x4dc   : > { %v1341_v47 = vadd.f32 1.0, %v1340_v52 }
 0x4dd   : > { %1637 = vrcp.f32 %v1301_v62  ;;  %v1313_v10 = vand.u32 2147483648, %v1301_v62  ;;  %v1311_v31 = vand.u32 2147483647, %v1301_v62  ;;  %vm1307_vm9 = vweird.f32 %v1301_v62 }
 0x4de   : > { %1639 = vrcp.f32 %v1341_v47  ;;  %v1353_v46 = vand.u32 2147483648, %v1341_v47  ;;  %v1351_v19 = vand.u32 2147483647, %v1341_v47  ;;  %vm1347_vm11 = vweird.f32 %v1341_v47 }
 0x4df   : > { %v1314_v54 = vor.u32 1.1754944e-38, %v1313_v10  ;;  %v1291_v28 = vmul.f32 %v1290_v36, %v2136_v41  ;;  %vm1312_vm12 = vcmp.eq.f32.partialorder %v1311_v31, 8.507059e+37  ;;  %v1331_v34 = vmul.f32 %v1330_v45, %v2139_v25 }
 0x4e0   : > { %v1354_v30 = vor.u32 1.1754944e-38, %v1353_v46  ;;  %vm1352_vm14 = vcmp.eq.f32.partialorder %v1351_v19, 8.507059e+37  ;;  %v1276_v41 = vmul.f32 0.5, %v2133_v29 }
 0x4e3   : > { %v1638_v12 = vpop.eup %1637 }
 0x4e4   : > { %v1640_v16 = vpop.eup %1639  ;;  %v1303_v18 = vmul.f32 %v1638_v12, %v1301_v62  ;;  %vm1308_vm7 = vweird.f32 %v1638_v12 }
 0x4e5   : > { %v1343_v35 = vmul.f32 %v1640_v16, %v1341_v47  ;;  %vm1348_vm8 = vweird.f32 %v1640_v16  ;;  %vm1309_vm10 = vmor %vm1307_vm9, %vm1308_vm7 }
 0x4e6   : > { %v1304_v6 = vsub.f32 1.0, %v1303_v18  ;;  %vm1349_vm13 = vmor %vm1347_vm11, %vm1348_vm8 }
 0x4e7   : > { %v1344_v2 = vsub.f32 1.0, %v1343_v35 }
 0x4e8   : > { %v1305_v14 = vmul.f32 %v1638_v12, %v1304_v6 }
 0x4e9   : > { %v1345_v5 = vmul.f32 %v1640_v16, %v1344_v2 }
 0x4ea   : > { %v1306_v23 = vadd.f32 %v1638_v12, %v1305_v14 }
 0x4eb   : > { %v1346_v27 = vadd.f32 %v1640_v16, %v1345_v5 }
 0x4ec   : > { %v1310_v44 = vsel %vm1309_vm10, %v1638_v12, %v1306_v23 }
 0x4ed   : > { %v1315_v38 = vsel %vm1312_vm12, %v1314_v54, %v1310_v44  ;;  %v1350_v39 = vsel %vm1349_vm13, %v1640_v16, %v1346_v27 }
 0x4ee   : > { %v1316_v40 = vmul.f32 %v1315_v38, %v1291_v28  ;;  %v1355_v20 = vsel %vm1352_vm14, %v1354_v30, %v1350_v39 }
 0x4ef   : > { %v1356_v15 = vmul.f32 %v1355_v20, %v1331_v34 }
 0x4f0   : > { %v1528_v22 = vclamps-f32 %v1316_v40, 1.0 }
 0x4f1   : > { %v1529_v32 = vclamps-f32 %v1356_v15, 1.0 }
 0x4f2   : > { %v1359_v24 = vadd.f32 1.0, %v1528_v22 }
 0x4f3   : > { %v1360_v53 = vadd.f32 1.0, %v1529_v32 }
 0x4f4   : > { %v1361_v55 = vmul.f32 %v1359_v24, %v1275_v50 }
 0x4f5   : > { %v1362_v25 = vmul.f32 %v1360_v53, %v1276_v41 }
 0x4f6   : > { %1363 = vst [vmem:[%s416_s17] sm:$0xff] %v1361_v55 }
 0x4f7   : > { %1364 = vst [vmem:[%s416_s17 + $0x8] sm:$0xff] %v1362_v25 }
 0x4f8 PF: > { %s18_s27 = sadd.s32 1, %s1647_s27  }
 0x4f9   : > { %p15_p4 = scmp.ge.s32.totalorder %s18_s27, 4  }
 0x4fb   :  { %17 = sbr.rel (!%p15_p4) target bundleno = 1 (0x1), region = 100 }

</bundles_post_ra>
